<compile_context>
chip_gen: v5e
topology: v5e:2x2
jax: 0.10.0
libtpu: 0.0.40
codegen_flags: <defaults>
</compile_context>

<pallas_src>
import jax
import jax.numpy as jnp
from jax import lax
from jax.experimental import pallas as pl
from jax.experimental.pallas import tpu as pltpu

_INV_SQRT_2 = 0.7071067811865476


def _gelu_exact(x):
    # matches torch.nn.functional.gelu default (erf-based, not tanh approx)
    return 0.5 * x * (1.0 + lax.erf(x * _INV_SQRT_2))


def _meta_kernel(x_ref,
                 w1_ref, b1_ref,
                 w2_ref, b2_ref,
                 w3_ref, b3_ref,
                 o_ref):
    # Feature-major layout: batch sits on the lane axis everywhere.
    xt = x_ref[...]          # (6, block_n)  f32
    w1 = w1_ref[...]         # (32, 6)       f32

    # fc1 (K=6) on the VPU: 6 broadcast-FMAs in f32 (exact first layer).
    h = w1[:, 0:1] * xt[0:1, :] + b1_ref[...]
    for k in range(1, 6):    # static unroll
        h = h + w1[:, k:k + 1] * xt[k:k + 1, :]
    h = _gelu_exact(h)                                   # (32, block_n)
    # BN1 (eval) is folded into w2/b2 on the host; dropout(p=0.7) is identity in eval.

    # fc2 (32 -> 128): (128,32) @ (32, block_n) on the MXU, bf16 in / f32 acc.
    h = jnp.dot(w2_ref[...], h.astype(jnp.bfloat16),
                preferred_element_type=jnp.float32) + b2_ref[...]
    h = _gelu_exact(h)                                   # (128, block_n)
    # BN2 folded into w3/b3; dropout identity.

    # fc3 (128 -> 3) + softmax over the class axis (axis 0 in this layout).
    logits = jnp.dot(w3_ref[...], h.astype(jnp.bfloat16),
                     preferred_element_type=jnp.float32) + b3_ref[...]
    m = jnp.max(logits, axis=0, keepdims=True)
    e = jnp.exp(logits - m)
    inv = pl.reciprocal(jnp.sum(e, axis=0, keepdims=True), approx=True)
    o_ref[...] = (e * inv).astype(o_ref.dtype)           # (3, block_n), lane-dense store


def _round_up(v, m):
    return ((v + m - 1) // m) * m


def _num_tensorcores():
    """Best-effort TensorCore-per-chip count (2 on v7x/v4/v5p, else 1)."""
    try:
        dk = jax.devices()[0].device_kind.lower()
    except Exception:
        return 1
    if "lite" in dk or "v5e" in dk or "v6e" in dk or "v6" in dk:
        return 1
    if "v7" in dk or "v4" in dk or "v5p" in dk:
        return 2
    return 1


def _choose_block_n(n, block_n_max, num_tc):
    # Batch lives on the lane axis -> block_n must be a multiple of 128.
    n128 = _round_up(max(n, 1), 128)
    if num_tc <= 1 or n128 <= 128:
        # Single TensorCore: fewest, largest blocks (grid=1 when it fits).
        block_n = min(block_n_max, n128)
    else:
        # Two TensorCores share the "parallel" axis: use an even number of
        # equal-size blocks so neither core gets a longer tail.
        steps = 2 * pl.cdiv(n128, 2 * block_n_max)
        block_n = min(block_n_max, _round_up(pl.cdiv(n128, steps), 128))
    n_pad = _round_up(n128, block_n)
    return block_n, n_pad


def meta_classifier_no_section(x, params, *, block_n_max=4096):
    (w1t, b1t, w2t, b2t, w3t, b3t) = params
    n, f_in = x.shape
    assert f_in == 6
    assert block_n_max % 128 == 0

    num_tc = _num_tensorcores()
    block_n, n_pad = _choose_block_n(n, block_n_max, num_tc)

    xt = x.T                                   # (6, n) feature-major
    if n_pad != n:
        xt = jnp.pad(xt, ((0, 0), (0, n_pad - n)))
    grid = (n_pad // block_n,)

    def rep(shape):
        # parameters are tiny and fully resident; same block every grid step
        return pl.BlockSpec(shape, lambda i: (0, 0))

    out_t = pl.pallas_call(
        _meta_kernel,
        out_shape=jax.ShapeDtypeStruct((3, n_pad), jnp.float32),
        grid_spec=pltpu.PrefetchScalarGridSpec(
            num_scalar_prefetch=0,
            grid=grid,
            in_specs=[pl.BlockSpec((6, block_n), lambda i: (0, i)),
                      rep(w1t.shape), rep(b1t.shape),
                      rep(w2t.shape), rep(b2t.shape),
                      rep(w3t.shape), rep(b3t.shape)],
            out_specs=pl.BlockSpec((3, block_n), lambda i: (0, i)),
        ),
        compiler_params=pltpu.CompilerParams(
            dimension_semantics=("parallel",)),
    )(xt, w1t, b1t, w2t, b2t, w3t, b3t)

    return out_t[:, :n].T                      # back to (n, 3)


def make_params(key):
    """Deterministic synthetic parameters with the shapes implied by __init__."""
    ks = jax.random.split(key, 16)
    eps = 1e-5

    def lin(kw, kb, fin, fout):
        bound = 1.0 / jnp.sqrt(fin)
        w = jax.random.uniform(kw, (fin, fout), jnp.float32, -bound, bound)
        b = jax.random.uniform(kb, (1, fout), jnp.float32, -bound, bound)
        return w, b

    w1, b1 = lin(ks[0], ks[1], 6, 32)
    w2, b2 = lin(ks[2], ks[3], 32, 128)
    w3, b3 = lin(ks[4], ks[5], 128, 3)

    def bn(kg, kb, km, kv, f):
        gamma = 1.0 + 0.1 * jax.random.normal(kg, (1, f), jnp.float32)
        beta = 0.1 * jax.random.normal(kb, (1, f), jnp.float32)
        rmean = 0.1 * jax.random.normal(km, (1, f), jnp.float32)
        rvar = 1.0 + 0.5 * jax.random.uniform(kv, (1, f), jnp.float32)
        scale = gamma / jnp.sqrt(rvar + eps)
        shift = beta - rmean * scale
        return scale, shift

    s1, t1 = bn(ks[6], ks[7], ks[8], ks[9], 32)
    s2, t2 = bn(ks[10], ks[11], ks[12], ks[13], 128)

    return (w1, b1, s1, t1, w2, b2, s2, t2, w3, b3)


def fold_params(raw):
    """Fold eval-mode BN into the following linear; transpose to feature-major."""
    (w1, b1, s1, t1, w2, b2, s2, t2, w3, b3) = raw
    # (h*s1 + t1) @ w2 + b2  ==  h @ (s1.T * w2) + (t1 @ w2 + b2)
    w2f = s1.T * w2                 # (32, 128)
    b2f = b2 + t1 @ w2              # (1, 128)
    w3f = s2.T * w3                 # (128, 3)
    b3f = b3 + t2 @ w3              # (1, 3)
    # Pre-transpose to (out, in) so the kernel computes W @ h with batch on lanes.
    return (w1.T.astype(jnp.float32),            # (32, 6)
            b1.T.astype(jnp.float32),            # (32, 1)
            w2f.T.astype(jnp.bfloat16),          # (128, 32)  bf16 MXU weight
            b2f.T.astype(jnp.float32),           # (128, 1)
            w3f.T.astype(jnp.bfloat16),          # (3, 128)   bf16 MXU weight
            b3f.T.astype(jnp.float32))           # (3, 1)


def _reference(x, raw):
    (w1, b1, s1, t1, w2, b2, s2, t2, w3, b3) = raw
    h = _gelu_exact(x @ w1 + b1) * s1 + t1
    h = _gelu_exact(h @ w2 + b2) * s2 + t2
    logits = h @ w3 + b3
    return jax.nn.softmax(logits, axis=1)


if __name__ == "__main__":
    key = jax.random.PRNGKey(0)
    kx, kp, kx2 = jax.random.split(key, 3)

    raw = make_params(kp)
    params = fold_params(raw)

    # small shape consistent with the module: batch=8, 6 input features
    x = jax.random.normal(kx, (8, 6), jnp.float32)
    out = jax.block_until_ready(meta_classifier_no_section(x, params))
    ref = _reference(x, raw)
    assert out.shape == (8, 3)
    # bf16 MXU weights/activations + approx reciprocal -> slightly looser tolerance
    assert jnp.allclose(out, ref, atol=2e-2, rtol=2e-2), "mismatch vs reference (small)"
    assert jnp.allclose(jnp.sum(out, axis=1), 1.0, atol=5e-3), "softmax rows must sum to 1"

    # larger, non-multiple batch to exercise the tiled / padded path
    x2 = jax.random.normal(kx2, (3000, 6), jnp.float32)
    out2 = jax.block_until_ready(meta_classifier_no_section(x2, params))
    ref2 = _reference(x2, raw)
    assert out2.shape == (3000, 3)
    assert jnp.allclose(out2, ref2, atol=2e-2, rtol=2e-2), "mismatch vs reference (large)"

    print("KERNEL_OK")
</pallas_src>

<mosaic_0001>
module attributes {stable_mosaic.version = 11 : i64} {
  func.func @_meta_kernel(%arg0: i32, %arg1: memref<6x128xf32, #tpu.memory_space<vmem>>, %arg2: memref<32x6xf32, #tpu.memory_space<vmem>>, %arg3: memref<32x1xf32, #tpu.memory_space<vmem>>, %arg4: memref<128x32xbf16, #tpu.memory_space<vmem>>, %arg5: memref<128x1xf32, #tpu.memory_space<vmem>>, %arg6: memref<3x128xbf16, #tpu.memory_space<vmem>>, %arg7: memref<3x1xf32, #tpu.memory_space<vmem>>, %arg8: memref<3x128xf32, #tpu.memory_space<vmem>>) attributes {dimension_semantics = [#tpu.dimension_semantics<parallel>], iteration_bounds = array<i64: 1>, scalar_prefetch = 0 : i64, scratch_operands = 0 : i64, tpu.core_type = #tpu.core_type<tc>, window_params = [{transform_indices = @transform_0, window_bounds = array<i64: 6, 128>}, {pipeline_mode = #tpu.pipeline_mode<synchronous>, transform_indices = @transform_1, window_bounds = array<i64: 32, 6>}, {pipeline_mode = #tpu.pipeline_mode<synchronous>, transform_indices = @transform_2, window_bounds = array<i64: 32, 1>}, {pipeline_mode = #tpu.pipeline_mode<synchronous>, transform_indices = @transform_3, window_bounds = array<i64: 128, 32>}, {pipeline_mode = #tpu.pipeline_mode<synchronous>, transform_indices = @transform_4, window_bounds = array<i64: 128, 1>}, {pipeline_mode = #tpu.pipeline_mode<synchronous>, transform_indices = @transform_5, window_bounds = array<i64: 3, 128>}, {pipeline_mode = #tpu.pipeline_mode<synchronous>, transform_indices = @transform_6, window_bounds = array<i64: 3, 1>}, {transform_indices = @transform_7, window_bounds = array<i64: 3, 128>}]} {
    %c0 = arith.constant 0 : index
    %c0_0 = arith.constant 0 : index
    %0 = vector.load %arg1[%c0, %c0_0] : memref<6x128xf32, #tpu.memory_space<vmem>>, vector<6x128xf32>
    %c0_1 = arith.constant 0 : index
    %c0_2 = arith.constant 0 : index
    %1 = vector.load %arg2[%c0_1, %c0_2] : memref<32x6xf32, #tpu.memory_space<vmem>>, vector<32x6xf32>
    %2 = vector.extract_strided_slice %1 {offsets = [0, 0], sizes = [32, 1], strides = [1, 1]} : vector<32x6xf32> to vector<32x1xf32>
    %3 = vector.extract_strided_slice %0 {offsets = [0, 0], sizes = [1, 128], strides = [1, 1]} : vector<6x128xf32> to vector<1x128xf32>
    %4 = vector.broadcast %2 : vector<32x1xf32> to vector<32x128xf32>
    %5 = vector.broadcast %3 : vector<1x128xf32> to vector<32x128xf32>
    %6 = arith.mulf %4, %5 : vector<32x128xf32>
    %c0_3 = arith.constant 0 : index
    %c0_4 = arith.constant 0 : index
    %7 = vector.load %arg3[%c0_3, %c0_4] : memref<32x1xf32, #tpu.memory_space<vmem>>, vector<32x1xf32>
    %8 = vector.broadcast %7 : vector<32x1xf32> to vector<32x128xf32>
    %9 = arith.addf %6, %8 : vector<32x128xf32>
    %10 = vector.extract_strided_slice %1 {offsets = [0, 1], sizes = [32, 1], strides = [1, 1]} : vector<32x6xf32> to vector<32x1xf32>
    %11 = vector.extract_strided_slice %0 {offsets = [1, 0], sizes = [1, 128], strides = [1, 1]} : vector<6x128xf32> to vector<1x128xf32>
    %12 = vector.broadcast %10 : vector<32x1xf32> to vector<32x128xf32>
    %13 = vector.broadcast %11 : vector<1x128xf32> to vector<32x128xf32>
    %14 = arith.mulf %12, %13 : vector<32x128xf32>
    %15 = arith.addf %9, %14 : vector<32x128xf32>
    %16 = vector.extract_strided_slice %1 {offsets = [0, 2], sizes = [32, 1], strides = [1, 1]} : vector<32x6xf32> to vector<32x1xf32>
    %17 = vector.extract_strided_slice %0 {offsets = [2, 0], sizes = [1, 128], strides = [1, 1]} : vector<6x128xf32> to vector<1x128xf32>
    %18 = vector.broadcast %16 : vector<32x1xf32> to vector<32x128xf32>
    %19 = vector.broadcast %17 : vector<1x128xf32> to vector<32x128xf32>
    %20 = arith.mulf %18, %19 : vector<32x128xf32>
    %21 = arith.addf %15, %20 : vector<32x128xf32>
    %22 = vector.extract_strided_slice %1 {offsets = [0, 3], sizes = [32, 1], strides = [1, 1]} : vector<32x6xf32> to vector<32x1xf32>
    %23 = vector.extract_strided_slice %0 {offsets = [3, 0], sizes = [1, 128], strides = [1, 1]} : vector<6x128xf32> to vector<1x128xf32>
    %24 = vector.broadcast %22 : vector<32x1xf32> to vector<32x128xf32>
    %25 = vector.broadcast %23 : vector<1x128xf32> to vector<32x128xf32>
    %26 = arith.mulf %24, %25 : vector<32x128xf32>
    %27 = arith.addf %21, %26 : vector<32x128xf32>
    %28 = vector.extract_strided_slice %1 {offsets = [0, 4], sizes = [32, 1], strides = [1, 1]} : vector<32x6xf32> to vector<32x1xf32>
    %29 = vector.extract_strided_slice %0 {offsets = [4, 0], sizes = [1, 128], strides = [1, 1]} : vector<6x128xf32> to vector<1x128xf32>
    %30 = vector.broadcast %28 : vector<32x1xf32> to vector<32x128xf32>
    %31 = vector.broadcast %29 : vector<1x128xf32> to vector<32x128xf32>
    %32 = arith.mulf %30, %31 : vector<32x128xf32>
    %33 = arith.addf %27, %32 : vector<32x128xf32>
    %34 = vector.extract_strided_slice %1 {offsets = [0, 5], sizes = [32, 1], strides = [1, 1]} : vector<32x6xf32> to vector<32x1xf32>
    %35 = vector.extract_strided_slice %0 {offsets = [5, 0], sizes = [1, 128], strides = [1, 1]} : vector<6x128xf32> to vector<1x128xf32>
    %36 = vector.broadcast %34 : vector<32x1xf32> to vector<32x128xf32>
    %37 = vector.broadcast %35 : vector<1x128xf32> to vector<32x128xf32>
    %38 = arith.mulf %36, %37 : vector<32x128xf32>
    %39 = arith.addf %33, %38 : vector<32x128xf32>
    %cst = arith.constant 5.000000e-01 : f32
    %40 = vector.broadcast %cst : f32 to vector<32x128xf32>
    %41 = arith.mulf %40, %39 : vector<32x128xf32>
    %cst_5 = arith.constant 0.707106769 : f32
    %42 = vector.broadcast %cst_5 : f32 to vector<32x128xf32>
    %43 = arith.mulf %39, %42 : vector<32x128xf32>
    %44 = math.erf %43 : vector<32x128xf32>
    %cst_6 = arith.constant 1.000000e+00 : f32
    %45 = vector.broadcast %cst_6 : f32 to vector<32x128xf32>
    %46 = arith.addf %45, %44 : vector<32x128xf32>
    %47 = arith.mulf %41, %46 : vector<32x128xf32>
    %c0_7 = arith.constant 0 : index
    %c0_8 = arith.constant 0 : index
    %48 = vector.load %arg4[%c0_7, %c0_8] : memref<128x32xbf16, #tpu.memory_space<vmem>>, vector<128x32xbf16>
    %49 = arith.truncf %47 : vector<32x128xf32> to vector<32x128xbf16>
    %cst_9 = arith.constant dense<0.000000e+00> : vector<128x128xf32>
    %50 = tpu.matmul %48, %49, %cst_9 {dimension_numbers = #tpu.dot_dimension_numbers<[1], [0], [0], [1], [0, 0, 1, 1], [], []>} : vector<128x32xbf16>, vector<32x128xbf16>, vector<128x128xf32> -> vector<128x128xf32>
    %c0_10 = arith.constant 0 : index
    %c0_11 = arith.constant 0 : index
    %51 = vector.load %arg5[%c0_10, %c0_11] : memref<128x1xf32, #tpu.memory_space<vmem>>, vector<128x1xf32>
    %52 = vector.broadcast %51 : vector<128x1xf32> to vector<128x128xf32>
    %53 = arith.addf %50, %52 : vector<128x128xf32>
    %cst_12 = arith.constant 5.000000e-01 : f32
    %54 = vector.broadcast %cst_12 : f32 to vector<128x128xf32>
    %55 = arith.mulf %54, %53 : vector<128x128xf32>
    %cst_13 = arith.constant 0.707106769 : f32
    %56 = vector.broadcast %cst_13 : f32 to vector<128x128xf32>
    %57 = arith.mulf %53, %56 : vector<128x128xf32>
    %58 = math.erf %57 : vector<128x128xf32>
    %cst_14 = arith.constant 1.000000e+00 : f32
    %59 = vector.broadcast %cst_14 : f32 to vector<128x128xf32>
    %60 = arith.addf %59, %58 : vector<128x128xf32>
    %61 = arith.mulf %55, %60 : vector<128x128xf32>
    %c0_15 = arith.constant 0 : index
    %c0_16 = arith.constant 0 : index
    %62 = vector.load %arg6[%c0_15, %c0_16] : memref<3x128xbf16, #tpu.memory_space<vmem>>, vector<3x128xbf16>
    %63 = arith.truncf %61 : vector<128x128xf32> to vector<128x128xbf16>
    %cst_17 = arith.constant dense<0.000000e+00> : vector<3x128xf32>
    %64 = tpu.matmul %62, %63, %cst_17 {dimension_numbers = #tpu.dot_dimension_numbers<[1], [0], [0], [1], [0, 0, 1, 1], [], []>} : vector<3x128xbf16>, vector<128x128xbf16>, vector<3x128xf32> -> vector<3x128xf32>
    %c0_18 = arith.constant 0 : index
    %c0_19 = arith.constant 0 : index
    %65 = vector.load %arg7[%c0_18, %c0_19] : memref<3x1xf32, #tpu.memory_space<vmem>>, vector<3x1xf32>
    %66 = vector.broadcast %65 : vector<3x1xf32> to vector<3x128xf32>
    %67 = arith.addf %64, %66 : vector<3x128xf32>
    %cst_20 = arith.constant dense<0xFF800000> : vector<128xf32>
    %68 = vector.multi_reduction <maximumf>, %67, %cst_20 [0] : vector<3x128xf32> to vector<128xf32>
    %69 = vector.shape_cast %68 : vector<128xf32> to vector<1x128xf32>
    %70 = vector.broadcast %69 : vector<1x128xf32> to vector<3x128xf32>
    %71 = arith.subf %67, %70 : vector<3x128xf32>
    %72 = math.exp %71 : vector<3x128xf32>
    %cst_21 = arith.constant dense<0.000000e+00> : vector<128xf32>
    %73 = vector.multi_reduction <add>, %72, %cst_21 [0] : vector<3x128xf32> to vector<128xf32>
    %74 = vector.shape_cast %73 : vector<128xf32> to vector<1x128xf32>
    %75 = tpu.reciprocal %74 {approx = true} : vector<1x128xf32> -> vector<1x128xf32>
    %76 = vector.broadcast %75 : vector<1x128xf32> to vector<3x128xf32>
    %77 = arith.mulf %72, %76 : vector<3x128xf32>
    %c0_22 = arith.constant 0 : index
    %c0_23 = arith.constant 0 : index
    %78 = vector.load %arg8[%c0_22, %c0_23] : memref<3x128xf32, #tpu.memory_space<vmem>>, vector<3x128xf32>
    tpu.vector_store %arg8[%c0_22, %c0_23], %77 {strides = array<i32>} : memref<3x128xf32, #tpu.memory_space<vmem>>, vector<3x128xf32>,
    return
  }
  func.func @transform_0(%arg0: i32) -> (i32, i32) {
    %c0_i32 = arith.constant 0 : i32
    %c0_i32_0 = arith.constant 0 : i32
    return %c0_i32, %arg0 : i32, i32
  }
  func.func @transform_1(%arg0: i32) -> (i32, i32) {
    %c0_i32 = arith.constant 0 : i32
    %c0_i32_0 = arith.constant 0 : i32
    %c0_i32_1 = arith.constant 0 : i32
    return %c0_i32, %c0_i32_0 : i32, i32
  }
  func.func @transform_2(%arg0: i32) -> (i32, i32) {
    %c0_i32 = arith.constant 0 : i32
    %c0_i32_0 = arith.constant 0 : i32
    %c0_i32_1 = arith.constant 0 : i32
    return %c0_i32, %c0_i32_0 : i32, i32
  }
  func.func @transform_3(%arg0: i32) -> (i32, i32) {
    %c0_i32 = arith.constant 0 : i32
    %c0_i32_0 = arith.constant 0 : i32
    %c0_i32_1 = arith.constant 0 : i32
    return %c0_i32, %c0_i32_0 : i32, i32
  }
  func.func @transform_4(%arg0: i32) -> (i32, i32) {
    %c0_i32 = arith.constant 0 : i32
    %c0_i32_0 = arith.constant 0 : i32
    %c0_i32_1 = arith.constant 0 : i32
    return %c0_i32, %c0_i32_0 : i32, i32
  }
  func.func @transform_5(%arg0: i32) -> (i32, i32) {
    %c0_i32 = arith.constant 0 : i32
    %c0_i32_0 = arith.constant 0 : i32
    %c0_i32_1 = arith.constant 0 : i32
    return %c0_i32, %c0_i32_0 : i32, i32
  }
  func.func @transform_6(%arg0: i32) -> (i32, i32) {
    %c0_i32 = arith.constant 0 : i32
    %c0_i32_0 = arith.constant 0 : i32
    %c0_i32_1 = arith.constant 0 : i32
    return %c0_i32, %c0_i32_0 : i32, i32
  }
  func.func @transform_7(%arg0: i32) -> (i32, i32) {
    %c0_i32 = arith.constant 0 : i32
    %c0_i32_0 = arith.constant 0 : i32
    return %c0_i32, %arg0 : i32, i32
  }
}

</mosaic_0001>

<bundles_post_ra>
// kernel: tpu_custom_call.1
= control target key start
LH: loop header
LB: loop body
LE: loop exit
PB: predicated region body
PF: predicated region fallthrough
CT: control target
= control target key end

     0   :  { %v1556_v2 = vmov 1   ;;  %v1557_v3 = vmov 0   ;;  %s2542_s0 = inlined_call_operand.vmem [shape: f32[6,128], index: 0, kind: input, shape index: {}]   ;;  %s2543_s1 = inlined_call_operand.vmem [shape: f32[32,6], index: 1, kind: input, shape index: {}]   ;;  %s2544_s2 = inlined_call_operand.vmem [shape: f32[32,1], index: 2, kind: input, shape index: {}]   ;;  %s2545_s3 = inlined_call_operand.vmem [shape: bf16[128,32], index: 3, kind: input, shape index: {}]   ;;  %s2546_s4 = inlined_call_operand.vmem [shape: f32[128,1], index: 4, kind: input, shape index: {}]   ;;  %s2547_s5 = inlined_call_operand.vmem [shape: bf16[3,128], index: 5, kind: input, shape index: {}]   ;;  %s2548_s6 = inlined_call_operand.vmem [shape: f32[3,1], index: 6, kind: input, shape index: {}]   ;;  %s2549_s7 = inlined_call_operand.hbm [shape: f32[3,128], index: 7, kind: output, shape index: {}]  }
   0x1   :  { %v60_v0 = vld [vmem:[%s2544_s2 + $0x10] sm:$0xff]  ;;  %1465 = vset.pattern.permute.xlu2 %v1556_v2  ;;  %1464 = vset.pattern.permute.xlu1 %v1557_v3 }
   0x2   :  { %v31_v1 = vld [vmem:[%s2543_s1 + $0x10] sm:$0xff]  ;;  %1463 = vset.pattern.permute.xlu0 %v1557_v3  ;;  %74 = vperm.xlu1 %1464, %v60_v0  }
   0x3   :  { %12 = vsyncpa [#allocation3], 0  ;;  %95 = vperm.xlu2 %1465, %v31_v1   ;;  %45 = vperm.xlu0 %1463, %v31_v1   ;;  %v61_v4 = vld [vmem:[%s2544_s2 + $0x18] sm:$0xff]  ;;  %v30_v6 = vld [vmem:[%s2543_s1 + $0x8] sm:$0xff]  ;;  %v1558_v8 = vmov 2   ;;  %v1559_v11 = vmov 3  }
   0x4   :  { %v32_v5 = vld [vmem:[%s2543_s1 + $0x18] sm:$0xff]  ;;  %v29_v7 = vld [vmem:[%s2543_s1] sm:$0xff]  ;;  %v59_v10 = vld [vmem:[%s2544_s2 + $0x8] sm:$0xff]  ;;  %v1560_v12 = vmov 4   ;;  %v1561_v13 = vmov 5  }
   0x5   :  { %v58_v9 = vld [vmem:[%s2544_s2] sm:$0xff] }
   0x6   :  { %v28_v28 = vld [vmem:[%s2542_s0] sm:$0x3f]  ;;  %s1375_s0 = sshll.u32 %s2549_s7, 4  ;;  %s1376_s0 = int_to_ptr.hbm [resolvable:$true] %s1375_s0 }
   0x7   :  { %v53_v30 = vperm.slane %v28_v28, 0  ;;  %v102_v33 = vperm.slane %v28_v28, 1  ;;  %v1634_v35 = vperm.slane %v28_v28, 2  ;;  %v1639_v41 = vperm.slane %v28_v28, 3 }
   0x8   :  { %v1641_v44 = vperm.slane %v28_v28, 4  ;;  %v1645_v49 = vperm.slane %v28_v28, 5 }
   0xa   :  { %79 = vperm.xlu1 %1464, %v61_v4  }
   0xb   :  { %99 = vperm.xlu2 %1465, %v32_v5   ;;  %50 = vperm.xlu0 %1463, %v32_v5  }
  0x12   :  { %40 = vperm.xlu1 %1464, %v30_v6  }
  0x13   :  { %1466 = vset.pattern.permute.xlu2 %v1558_v8  ;;  %35 = vperm.xlu0 %1463, %v29_v7  }
  0x14   :  { %120 = vperm.xlu2 %1466, %v31_v1  }
  0x1a   :  { %64 = vperm.xlu1 %1464, %v58_v9  }
  0x1b   :  { %1467 = vset.pattern.permute.xlu0 %v1558_v8 }
  0x1c   :  { %1468 = vset.pattern.permute.xlu2 %v1557_v3  ;;  %124 = vperm.xlu0 %1467, %v32_v5  }
  0x1d   :  { %69 = vperm.xlu2 %1468, %v59_v10  }
  0x22   :  { %1469 = vset.pattern.permute.xlu1 %v1556_v2 }
  0x23   :  { %87 = vperm.xlu1 %1469, %v29_v7  }
  0x24   :  { %1471 = vset.pattern.permute.xlu0 %v1559_v11 }
  0x25   :  { %1470 = vset.pattern.permute.xlu2 %v1556_v2  ;;  %145 = vperm.xlu0 %1471, %v31_v1  }
  0x26   :  { %91 = vperm.xlu2 %1470, %v30_v6  }
  0x2b   :  { %1472 = vset.pattern.permute.xlu1 %v1559_v11 }
  0x2c   :  { %149 = vperm.xlu1 %1472, %v32_v5  }
  0x2d   :  { %1476 = vset.pattern.permute.xlu0 %v1560_v12 }
  0x2e   :  { %1473 = vset.pattern.permute.xlu2 %v1558_v8  ;;  %174 = vperm.xlu0 %1476, %v32_v5  }
  0x2f   :  { %112 = vperm.xlu2 %1473, %v29_v7  }
  0x34   :  { %1474 = vset.pattern.permute.xlu1 %v1558_v8 }
  0x35   :  { %116 = vperm.xlu1 %1474, %v30_v6  }
  0x36   :  { %162 = vperm.xlu0 %1476, %v29_v7  }
  0x37   :  { %1475 = vset.pattern.permute.xlu2 %v1560_v12 }
  0x38   :  { %170 = vperm.xlu2 %1475, %v31_v1  }
  0x3d   :  { %1477 = vset.pattern.permute.xlu1 %v1559_v11 }
  0x3e   :  { %137 = vperm.xlu1 %1477, %v29_v7   ;;  %1482 = vset.pattern.permute.xlu0 %v1561_v13 }
  0x3f   :  { %191 = vperm.xlu0 %1482, %v30_v6  }
  0x40   :  { %1478 = vset.pattern.permute.xlu2 %v1559_v11 }
  0x41   :  { %141 = vperm.xlu2 %1478, %v30_v6  }
  0x46   :  { %1479 = vset.pattern.permute.xlu1 %v1561_v13 }
  0x47   :  { %195 = vperm.xlu1 %1479, %v31_v1   ;;  %1485 = vset.pattern.permute.xlu0 %v1557_v3 }
  0x49   :  { %1480 = vset.pattern.permute.xlu2 %v1561_v13 }
  0x4a   :  { %199 = vperm.xlu2 %1480, %v32_v5  }
  0x4f   :  { %1481 = vset.pattern.permute.xlu1 %v1560_v12 }
  0x50   :  { %166 = vperm.xlu1 %1481, %v30_v6  }
  0x52   :  { %187 = vperm.xlu2 %1480, %v29_v7  }
  0x58   :  { %1483 = vset.pattern.permute.xlu1 %v1557_v3 }
  0x5a   :  { %1484 = vset.pattern.permute.xlu2 %v1557_v3 }
  0x5d   :  { %v96_v14 = vpop.permute.xlu2 %95 }
  0x5e   :  { %v105_v61 = vmul.f32 %v102_v33, %v96_v14 }
  0x65   :  { %v100_v15 = vpop.permute.xlu2 %99 }
  0x66   :  { %v106_v37 = vmul.f32 %v102_v33, %v100_v15 }
  0x6e   :  { %v121_v16 = vpop.permute.xlu2 %120 }
  0x6f   :  { %v130_v4 = vmul.f32 %v1634_v35, %v121_v16 }
  0x74   :  { %v75_v17 = vpop.permute.xlu1 %74 }
  0x75   :  { %v46_v18 = vpop.permute.xlu0 %45 }
  0x76   :  { %v56_v55 = vmul.f32 %v53_v30, %v46_v18 }
  0x77   :  { %v1627_v19 = vpop.permute.xlu2 %69 }
  0x78   :  { %v84_v62 = vadd.f32 %v75_v17, %v56_v55 }
  0x7a   :  { %v109_v5 = vadd.f32 %v105_v61, %v84_v62 }
  0x7c   :  { %v80_v20 = vpop.permute.xlu1 %79  ;;  %v134_v17 = vadd.f32 %v130_v4, %v109_v5 }
  0x7d   :  { %v51_v21 = vpop.permute.xlu0 %50 }
  0x7e   :  { %v57_v31 = vmul.f32 %v53_v30, %v51_v21 }
  0x80   :  { %v1629_v22 = vpop.permute.xlu2 %91  ;;  %v85_v36 = vadd.f32 %v80_v20, %v57_v31 }
  0x81   :  { %v104_v28 = vmul.f32 %v102_v33, %v1629_v22 }
  0x82   :  { %v110_v40 = vadd.f32 %v106_v37, %v85_v36 }
  0x84   :  { %v41_v23 = vpop.permute.xlu1 %40 }
  0x85   :  { %v36_v24 = vpop.permute.xlu0 %35  ;;  %v55_v21 = vmul.f32 %v53_v30, %v41_v23 }
  0x86   :  { %v54_v56 = vmul.f32 %v53_v30, %v36_v24 }
  0x87   :  { %v83_v36 = vadd.f32 %v1627_v19, %v55_v21 }
  0x89   :  { %v113_v25 = vpop.permute.xlu2 %112 }
  0x8a   :  { %v128_v63 = vmul.f32 %v1634_v35, %v113_v25 }
  0x8c   :  { %v65_v26 = vpop.permute.xlu1 %64 }
  0x8d   :  { %v82_v59 = vadd.f32 %v65_v26, %v54_v56 }
  0x8e   :  { %v125_v27 = vpop.permute.xlu0 %124 }
  0x8f   :  { %v131_v38 = vmul.f32 %v1634_v35, %v125_v27 }
  0x91   :  { %v135_v43 = vadd.f32 %v131_v38, %v110_v40 }
  0x92   :  { %v171_v29 = vpop.permute.xlu2 %170 }
  0x93   :  { %v180_v24 = vmul.f32 %v1641_v44, %v171_v29 }
  0x95   :  { %v88_v32 = vpop.permute.xlu1 %87 }
  0x96   :  { %v103_v57 = vmul.f32 %v102_v33, %v88_v32 }
  0x97   :  { %v146_v34 = vpop.permute.xlu0 %145 }
  0x98   :  { %v107_v0 = vadd.f32 %v103_v57, %v82_v59  ;;  %v155_v12 = vmul.f32 %v1639_v41, %v146_v34 }
  0x9a   :  { %v132_v9 = vadd.f32 %v128_v63, %v107_v0  ;;  %v159_v25 = vadd.f32 %v155_v12, %v134_v17 }
  0x9b   :  { %v1637_v39 = vpop.permute.xlu2 %141 }
  0x9c   :  { %v184_v38 = vadd.f32 %v180_v24, %v159_v25 }
  0x9e   :  { %v150_v42 = vpop.permute.xlu1 %149 }
  0x9f   :  { %v156_v45 = vmul.f32 %v1639_v41, %v150_v42 }
  0xa0   :  { %v175_v46 = vpop.permute.xlu0 %174 }
  0xa1   :  { %v160_v47 = vadd.f32 %v156_v45, %v135_v43  ;;  %v181_v48 = vmul.f32 %v1641_v44, %v175_v46  ;;  %v108_v43 = vadd.f32 %v104_v28, %v83_v36 }
  0xa3   :  { %v185_v50 = vadd.f32 %v181_v48, %v160_v47  ;;  %v154_v47 = vmul.f32 %v1639_v41, %v1637_v39 }
  0xa4   :  { %v200_v51 = vpop.permute.xlu2 %199 }
  0xa5   :  { %v206_v52 = vmul.f32 %v1645_v49, %v200_v51 }
  0xa7   :  { %v1648_v53 = vadd.f32 %v206_v52, %v185_v50  ;;  %v117_v54 = vpop.permute.xlu1 %116 }
  0xa8   :  { %v163_v2 = vpop.permute.xlu0 %162  ;;  %v129_v30 = vmul.f32 %v1634_v35, %v117_v54 }
  0xa9   :  { %v1651_v58 = vmul.f32 0.70710677, %v1648_v53  ;;  %v178_v11 = vmul.f32 %v1641_v44, %v163_v2 }
  0xaa   :  { %v133_v35 = vadd.f32 %v129_v30, %v108_v43 }
  0xab   :  { %v339_v60 = vmul.f32 %v1651_v58, %v1651_v58 }
  0xac   :  { %v188_v7 = vpop.permute.xlu2 %187 }
  0xad   :  { %v1656_v1 = vmin.f32 %v339_v60, 16.0  ;;  %v203_v15 = vmul.f32 %v1645_v49, %v188_v7 }
  0xaf   :  { %v352_v3 = vmul.f32 3.8918573e-05, %v1656_v1  ;;  %v341_v18 = vmul.f32 2.1237322e-06, %v1656_v1 }
  0xb0   :  { %v138_v6 = vpop.permute.xlu1 %137 }
  0xb1   :  { %v353_v8 = vadd.f32 0.001143296, %v352_v3  ;;  %v153_v10 = vmul.f32 %v1639_v41, %v138_v6  ;;  %v342_v31 = vadd.f32 0.00028619796, %v341_v18  ;;  %v192_v57 = vpop.permute.xlu0 %191  ;;  %v158_v41 = vadd.f32 %v154_v47, %v133_v35 }
  0xb2   :  { %v204_v63 = vmul.f32 %v1645_v49, %v192_v57 }
  0xb3   :  { %v354_v13 = vmul.f32 %v353_v8, %v1656_v1  ;;  %v157_v14 = vadd.f32 %v153_v10, %v132_v9  ;;  %v343_v22 = vmul.f32 %v342_v31, %v1656_v1 }
  0xb5   :  { %v355_v16 = vadd.f32 0.014752088, %v354_v13  ;;  %v182_v20 = vadd.f32 %v178_v11, %v157_v14  ;;  %v344_v51 = vadd.f32 0.0036580483, %v343_v22 }
  0xb7   :  { %v356_v26 = vmul.f32 %v355_v16, %v1656_v1  ;;  %v1668_v27 = vadd.f32 %v203_v15, %v182_v20  ;;  %v345_v60 = vmul.f32 %v344_v51, %v1656_v1 }
  0xb9   :  { %v357_v32 = vadd.f32 0.112945676, %v356_v26  ;;  %v196_v34 = vpop.permute.xlu1 %195  ;;  %v1673_v37 = vmul.f32 0.70710677, %v1668_v27  ;;  %v346_v8 = vadd.f32 0.05243302, %v345_v60 }
  0xba   :  { %v205_v23 = vmul.f32 %v1645_v49, %v196_v34 }
  0xbb   :  { %v358_v29 = vmul.f32 %v357_v32, %v1656_v1  ;;  %v219_v40 = vmul.f32 %v1673_v37, %v1673_v37  ;;  %v347_v18 = vmul.f32 %v346_v8, %v1656_v1 }
  0xbc   :  { %v1680_v42 = vadd.f32 %v205_v23, %v184_v38 }
  0xbd   :  { %v359_v33 = vadd.f32 0.4994258, %v358_v29  ;;  %v1683_v19 = vmin.f32 %v219_v40, 16.0  ;;  %v348_v34 = vadd.f32 0.18741608, %v347_v18 }
  0xbe   :  { %v1686_v45 = vmul.f32 0.70710677, %v1680_v42 }
  0xbf   :  { %v360_v46 = vmul.f32 %v359_v33, %v1656_v1  ;;  %v232_v48 = vmul.f32 3.8918573e-05, %v1683_v19  ;;  %v221_v0 = vmul.f32 2.1237322e-06, %v1683_v19 }
  0xc0   :  { %v299_v50 = vmul.f32 %v1686_v45, %v1686_v45 }
  0xc1   :  { %v1694_v52 = vadd.f32 1.0, %v360_v46  ;;  %v233_v54 = vadd.f32 0.001143296, %v232_v48  ;;  %v349_v48 = vmul.f32 %v348_v34, %v1656_v1  ;;  %v420_v1 = vld [vmem:[%s2546_s4 + $0x78] sm:$0xff] }
  0xc2   :  { %v1696_v55 = vmin.f32 %v299_v50, 16.0  ;;  %v167_v56 = vpop.permute.xlu1 %166  ;;  %498 = vperm.xlu2 %1484, %v420_v1  }
  0xc3   :  { %1486 = vrcp.f32 %v1694_v52  ;;  %v234_v59 = vmul.f32 %v233_v54, %v1683_v19  ;;  %v179_v62 = vmul.f32 %v1641_v44, %v167_v56  ;;  %v222_v44 = vadd.f32 0.00028619796, %v221_v0  ;;  %v419_v54 = vld [vmem:[%s2546_s4 + $0x70] sm:$0xff] }
  0xc4   :  { %v301_v39 = vmul.f32 2.1237322e-06, %v1696_v55  ;;  %v312_v61 = vmul.f32 3.8918573e-05, %v1696_v55  ;;  %493 = vperm.xlu1 %1483, %v419_v54   ;;  %vm367_vm1 = vweird.f32 %v1694_v52 }
  0xc5   :  { %v235_v2 = vadd.f32 0.014752088, %v234_v59  ;;  %v183_v5 = vadd.f32 %v179_v62, %v158_v41  ;;  %v223_v20 = vmul.f32 %v222_v44, %v1683_v19  ;;  %v415_v41 = vld [vmem:[%s2546_s4 + $0x50] sm:$0xff] }
  0xc6   :  { %v302_v3 = vadd.f32 0.00028619796, %v301_v39  ;;  %v313_v4 = vadd.f32 0.001143296, %v312_v61  ;;  %v373_v39 = vand.u32 2147483648, %v1694_v52  ;;  %473 = vperm.xlu0 %1485, %v415_v41  }
  0xc7   :  { %v236_v6 = vmul.f32 %v235_v2, %v1683_v19  ;;  %v1711_v11 = vadd.f32 %v204_v63, %v183_v5  ;;  %v224_v38 = vadd.f32 0.0036580483, %v223_v20  ;;  %v371_v61 = vand.u32 2147483647, %v1694_v52 }
  0xc8   :  { %v303_v9 = vmul.f32 %v302_v3, %v1696_v55  ;;  %v314_v10 = vmul.f32 %v313_v4, %v1696_v55  ;;  %v350_v3 = vadd.f32 1.1283791, %v349_v48  ;;  %v374_v8 = vor.u32 1.1754944e-38, %v373_v39 }
  0xc9   :  { %v1707_v7 = vpop.eup %1486  ;;  %v237_v12 = vadd.f32 0.112945676, %v236_v6  ;;  %v1717_v17 = vmul.f32 0.70710677, %v1711_v11  ;;  %v225_v46 = vmul.f32 %v224_v38, %v1683_v19  ;;  %vm372_vm3 = vcmp.eq.f32.partialorder %v371_v61, 8.507059e+37 }
  0xca   :  { %v304_v49 = vadd.f32 0.0036580483, %v303_v9  ;;  %v315_v13 = vadd.f32 0.014752088, %v314_v10  ;;  %v363_v14 = vmul.f32 %v1707_v7, %v1694_v52  ;;  %vm368_vm0 = vweird.f32 %v1707_v7  ;;  %v417_v52 = vld [vmem:[%s2546_s4 + $0x60] sm:$0xff] }
  0xcb   :  { %v238_v15 = vmul.f32 %v237_v12, %v1683_v19  ;;  %v259_v24 = vmul.f32 %v1717_v17, %v1717_v17  ;;  %v226_v62 = vadd.f32 0.05243302, %v225_v46  ;;  %vm369_vm2 = vmor %vm367_vm1, %vm368_vm0  ;;  %v416_v46 = vld [vmem:[%s2546_s4 + $0x58] sm:$0xff]  ;;  %vm541_vm0 = vcmask 261120  }
  0xcc   :  { %v316_v16 = vmul.f32 %v315_v13, %v1696_v55  ;;  %v305_v25 = vmul.f32 %v304_v49, %v1696_v55  ;;  %v364_v28 = vsub.f32 1.0, %v363_v14  ;;  %v351_v13 = vmul.f32 %v350_v3, %v1651_v58  ;;  %483 = vperm.xlu1 %1483, %v417_v52  }
  0xcd   :  { %v239_v21 = vadd.f32 0.4994258, %v238_v15  ;;  %v1726_v32 = vmin.f32 %v259_v24, 16.0  ;;  %v227_v9 = vmul.f32 %v226_v62, %v1683_v19  ;;  %v413_v62 = vld [vmem:[%s2546_s4 + $0x40] sm:$0xff] }
  0xce   :  { %v317_v26 = vadd.f32 0.112945676, %v316_v16  ;;  %v306_v30 = vadd.f32 0.05243302, %v305_v25  ;;  %v365_v33 = vmul.f32 %v1707_v7, %v364_v28 }
  0xcf   :  { %v240_v31 = vmul.f32 %v239_v21, %v1683_v19  ;;  %v261_v29 = vmul.f32 2.1237322e-06, %v1726_v32  ;;  %v272_v22 = vmul.f32 3.8918573e-05, %v1726_v32  ;;  %v228_v20 = vadd.f32 0.18741608, %v227_v9 }
  0xd0   :  { %v318_v36 = vmul.f32 %v317_v26, %v1696_v55  ;;  %v307_v50 = vmul.f32 %v306_v30, %v1696_v55  ;;  %v366_v56 = vadd.f32 %v1707_v7, %v365_v33 }
  0xd1   :  { %v1729_v23 = vadd.f32 1.0, %v240_v31  ;;  %v262_v47 = vadd.f32 0.00028619796, %v261_v29  ;;  %v273_v35 = vadd.f32 0.001143296, %v272_v22  ;;  %v1450_v29 = vld [vmem:[%s2545_s3 + $0x30] sm:$0xff] }
  0xd2   :  { %v319_v40 = vadd.f32 0.4994258, %v318_v36  ;;  %v308_v0 = vadd.f32 0.18741608, %v307_v50  ;;  %v370_v4 = vsel %vm369_vm2, %v1707_v7, %v366_v56  ;;  %v229_v36 = vmul.f32 %v228_v20, %v1683_v19  ;;  %v418_v19 = vld [vmem:[%s2546_s4 + $0x68] sm:$0xff] }
  0xd3   :  { %1488 = vrcp.f32 %v1729_v23  ;;  %v263_v57 = vmul.f32 %v262_v47, %v1726_v32  ;;  %v274_v59 = vmul.f32 %v273_v35, %v1726_v32  ;;  %v375_v12 = vsel %vm372_vm3, %v374_v8, %v370_v4  ;;  %v412_v47 = vld [vmem:[%s2546_s4 + $0x38] sm:$0xff]  ;;  %488 = vperm.xlu2 %1484, %v418_v19   ;;  %v406_v20 = vld [vmem:[%s2546_s4 + $0x8] sm:$0xff] }
  0xd4   :  { %v320_v43 = vmul.f32 %v319_v40, %v1696_v55  ;;  %v309_v49 = vmul.f32 %v308_v0, %v1696_v55  ;;  %v376_v16 = vmul.f32 %v375_v12, %v351_v13  ;;  %478 = vperm.xlu1 %1483, %v416_v46   ;;  %v253_v48 = vand.u32 2147483648, %v1729_v23  ;;  %458 = vperm.xlu0 %1485, %v412_v47   ;;  %v1446_v46 = vld [vmem:[%s2545_s3 + $0x10] sm:$0xff]  ;;  %v1449_v19 = vld [vmem:[%s2545_s3 + $0x28] sm:$0xff] }
  0xd5   :  { %v275_v63 = vadd.f32 0.014752088, %v274_v59  ;;  %v264_v2 = vadd.f32 0.0036580483, %v263_v57  ;;  %vm247_vm9 = vweird.f32 %v1729_v23  ;;  %v230_v59 = vadd.f32 1.1283791, %v229_v36 }
  0xd6   :  { %v1739_v51 = vadd.f32 1.0, %v320_v43  ;;  %v310_v25 = vadd.f32 1.1283791, %v309_v49  ;;  %v1387_v40 = vclamps-f32 %v376_v16, 1.0  ;;  %v254_v61 = vor.u32 1.1754944e-38, %v253_v48  ;;  %v411_v16 = vld [vmem:[%s2546_s4 + $0x30] sm:$0xff] }
  0xd7   :  { %v276_v6 = vmul.f32 %v275_v63, %v1726_v32  ;;  %v265_v7 = vmul.f32 %v264_v2, %v1726_v32  ;;  %v214_v0 = vmul.f32 0.5, %v1648_v53  ;;  %v213_v2 = vmul.f32 0.5, %v1680_v42 }
  0xd8   :  { %1490 = vrcp.f32 %v1739_v51  ;;  %v333_v26 = vand.u32 2147483648, %v1739_v51  ;;  %v331_v58 = vand.u32 2147483647, %v1739_v51  ;;  %vm327_vm5 = vweird.f32 %v1739_v51 }
  0xd9   :  { %v1756_v60 = vpop.eup %1488  ;;  %v277_v10 = vadd.f32 0.112945676, %v276_v6  ;;  %v266_v28 = vadd.f32 0.05243302, %v265_v7  ;;  %v311_v22 = vmul.f32 %v310_v25, %v1686_v45  ;;  %v382_v41 = vadd.f32 1.0, %v1387_v40  ;;  %v405_v40 = vld [vmem:[%s2546_s4] sm:$0xff] }
  0xda   :  { %v243_v5 = vmul.f32 %v1756_v60, %v1729_v23  ;;  %vm248_vm7 = vweird.f32 %v1756_v60  ;;  %v334_v33 = vor.u32 1.1754944e-38, %v333_v26  ;;  %vm332_vm8 = vcmp.eq.f32.partialorder %v331_v58, 8.507059e+37  ;;  %v410_v58 = vld [vmem:[%s2546_s4 + $0x28] sm:$0xff] }
  0xdb   :  { %v278_v18 = vmul.f32 %v277_v10, %v1726_v32  ;;  %v267_v43 = vmul.f32 %v266_v28, %v1726_v32  ;;  %vm1808_vm10 = vmor %vm247_vm9, %vm248_vm7  ;;  %v231_v8 = vmul.f32 %v230_v59, %v1673_v37  ;;  %v386_v9 = vmul.f32 %v382_v41, %v214_v0  ;;  %463 = vperm.xlu2 %1484, %v413_v62  }
  0xdc   :  { %v244_v14 = vsub.f32 1.0, %v243_v5  ;;  %v211_v26 = vmul.f32 0.5, %v1668_v27  ;;  %v212_v28 = vmul.f32 0.5, %v1711_v11  ;;  %v1444_v27 = vld [vmem:[%s2545_s3] sm:$0xff]  ;;  %v1447_v11 = vld [vmem:[%s2545_s3 + $0x18] sm:$0xff] }
  0xdd   :  { %v279_v24 = vadd.f32 0.4994258, %v278_v18  ;;  %v268_v57 = vadd.f32 0.18741608, %v267_v43  ;;  %v409_v18 = vld [vmem:[%s2546_s4 + $0x20] sm:$0xff]  ;;  %v1451_v43 = vld [vmem:[%s2545_s3 + $0x38] sm:$0xff] }
  0xde   :  { %v1491_v44 = vpop.eup %1490  ;;  %v245_v55 = vmul.f32 %v1756_v60, %v244_v14 }
  0xdf   :  { %v323_v15 = vmul.f32 %v1491_v44, %v1739_v51  ;;  %vm328_vm4 = vweird.f32 %v1491_v44  ;;  %v280_v34 = vmul.f32 %v279_v24, %v1726_v32  ;;  %v251_v51 = vand.u32 2147483647, %v1729_v23  ;;  %v414_v23 = vld [vmem:[%s2546_s4 + $0x48] sm:$0xff] }
  0xe0   :  { %vm1781_vm6 = vmor %vm327_vm5, %vm328_vm4  ;;  %v246_v35 = vadd.f32 %v1756_v60, %v245_v55  ;;  %v269_v5 = vmul.f32 %v268_v57, %v1726_v32  ;;  %468 = vperm.xlu1 %1483, %v414_v23  }
  0xe1   :  { %v324_v21 = vsub.f32 1.0, %v323_v15  ;;  %v1785_v30 = vadd.f32 1.0, %v280_v34  ;;  %vm252_vm11 = vcmp.eq.f32.partialorder %v251_v51, 8.507059e+37 }
  0xe2   :  { %v250_v39 = vsel %vm1808_vm10, %v1756_v60, %v246_v35  ;;  %v407_v60 = vld [vmem:[%s2546_s4 + $0x10] sm:$0xff]  ;;  %v270_v12 = vadd.f32 1.1283791, %v269_v5 }
  0xe3   :  { %v325_v31 = vmul.f32 %v1491_v44, %v324_v21  ;;  %1492 = vrcp.f32 %v1785_v30  ;;  %v255_v4 = vsel %vm252_vm11, %v254_v61, %v250_v39  ;;  %433 = vperm.xlu0 %1485, %v407_v60   ;;  %v293_v42 = vand.u32 2147483648, %v1785_v30  ;;  %453 = vperm.xlu2 %1484, %v411_v16  }
  0xe4   :  { %v256_v10 = vmul.f32 %v255_v4, %v231_v8  ;;  %v291_v7 = vand.u32 2147483647, %v1785_v30  ;;  %vm287_vm13 = vweird.f32 %v1785_v30  ;;  %v271_v13 = vmul.f32 %v270_v12, %v1717_v17 }
  0xe5   :  { %v326_v38 = vadd.f32 %v1491_v44, %v325_v31  ;;  %v294_v37 = vor.u32 1.1754944e-38, %v293_v42  ;;  %v408_v31 = vld [vmem:[%s2546_s4 + $0x18] sm:$0xff] }
  0xe6   :  { %vm292_vm15 = vcmp.eq.f32.partialorder %v291_v7, 8.507059e+37  ;;  %v1384_v15 = vclamps-f32 %v256_v10, 1.0 }
  0xe7   :  { %v330_v45 = vsel %vm1781_vm6, %v1491_v44, %v326_v38 }
  0xe8   :  { %v335_v50 = vsel %vm332_vm8, %v334_v33, %v330_v45  ;;  %443 = vperm.xlu1 %1483, %v409_v18   ;;  %v379_v25 = vadd.f32 1.0, %v1384_v15  ;;  %v1448_v33 = vld [vmem:[%s2545_s3 + $0x20] sm:$0xff] }
  0xe9   :  { %v336_v54 = vmul.f32 %v335_v50, %v311_v22  ;;  %v1493_v63 = vpop.eup %1492  ;;  %v1445_v22 = vld [vmem:[%s2545_s3 + $0x8] sm:$0xff] }
  0xea   :  { %v283_v6 = vmul.f32 %v1493_v63, %v1785_v30  ;;  %vm288_vm12 = vweird.f32 %v1493_v63  ;;  %v383_v34 = vmul.f32 %v379_v25, %v211_v26  ;;  %v1328_v30 = vld [vmem:[%s2548_s6] sm:$0x7] }
  0xeb   :  { %v1386_v1 = vclamps-f32 %v336_v54, 1.0  ;;  %vm289_vm14 = vmor %vm287_vm13, %vm288_vm12  ;;  %428 = vperm.xlu0 %1485, %v406_v20   ;;  %448 = vperm.xlu2 %1484, %v410_v58  }
  0xec   :  { %v284_v53 = vsub.f32 1.0, %v283_v6 }
  0xed   :  { %v381_v3 = vadd.f32 1.0, %v1386_v1 }
  0xee   :  { %v285_v49 = vmul.f32 %v1493_v63, %v284_v53 }
  0xef   :  { %v385_v52 = vmul.f32 %v381_v3, %v213_v2 }
  0xf0   :  { %v286_v32 = vadd.f32 %v1493_v63, %v285_v49  ;;  %438 = vperm.xlu1 %1483, %v408_v31  }
  0xf1   :  { %v404_v44 = vpack.c.bf16 %v386_v9, %v385_v52 }
  0xf2   :  { %v290_v14 = vsel %vm289_vm14, %v1493_v63, %v286_v32 }
  0xf3   :  { %572 = vmatpush.bf16.msra.mxu0 %v404_v44  ;;  %1452 = vmatpush.bf16.msra.mxu2 %v404_v44  ;;  %v295_v21 = vsel %vm292_vm15, %v294_v37, %v290_v14 }
  0xf4   :  { %1453 = vmatpush.bf16.msra.mxu3 %v404_v44  ;;  %v296_v24 = vmul.f32 %v295_v21, %v271_v13  ;;  %423 = vperm.xlu2 %1484, %v405_v40  }
  0xf6   :  { %v1385_v17 = vclamps-f32 %v296_v24, 1.0 }
  0xf8   :  { %v380_v55 = vadd.f32 1.0, %v1385_v17  ;;  %1331 = vperm.xlu1 %1483, %v1328_v30  }
  0xfa   :  { %v384_v36 = vmul.f32 %v380_v55, %v212_v28 }
  0xfc   :  { %v403_v38 = vpack.c.bf16 %v384_v36, %v383_v34 }
  0xfe   :  { %573 = vmatpush.bf16.msra.mxu0 %v403_v38  ;;  %1454 = vmatpush.bf16.msra.mxu2 %v403_v38 }
  0xff   :  { %1455 = vmatpush.bf16.msra.mxu3 %v403_v38 }
 0x101   :  { %1420 = vmatmul.msk.bf16.vlgmr.msra.gmra.mxu0 %vm541_vm0, %v1444_v27  ;;  %1423 = vmatmul.msk.bf16.vlgmr.msra.gmra.mxu2 %vm541_vm0, %v1447_v11 }
 0x102   :  { %1426 = vmatmul.msk.bf16.vlgmr.msra.gmra.mxu3 %vm541_vm0, %v1450_v29 }
 0x111   :  { %1421 = vmatmul.msk.bf16.gmra.mxu0 %vm541_vm0, %v1445_v22  ;;  %1424 = vmatmul.msk.bf16.gmra.mxu2 %vm541_vm0, %v1448_v33 }
 0x112   :  { %1427 = vmatmul.msk.bf16.gmra.mxu3 %vm541_vm0, %v1451_v43 }
 0x11c   :  { %v1888_v47 = vpop.permute.xlu2 %498 }
 0x121   :  { %1422 = vmatmul.msk.bf16.gmra.mxu0 %vm541_vm0, %v1446_v46  ;;  %1425 = vmatmul.msk.bf16.gmra.mxu2 %vm541_vm0, %v1449_v19 }
 0x12d   :  { %v489_v35 = vpop.permute.xlu2 %488 }
 0x135   :  { %v464_v45 = vpop.permute.xlu2 %463 }
 0x136   :  { %v1892_v50 = vpop.permute.xlu1 %493 }
 0x138   :  { %v1890_v48 = vpop.permute.xlu0 %473 }
 0x13d   :  { %v454_v51 = vpop.permute.xlu2 %453 }
 0x13e   :  { %v484_v56 = vpop.permute.xlu1 %483 }
 0x145   :  { %v1894_v57 = vpop.permute.xlu2 %448 }
 0x146   :  { %v459_v54 = vpop.permute.xlu0 %458  ;;  %v1896_v1 = vpop.permute.xlu1 %478 }
 0x14e   :  { %v424_v62 = vpop.permute.xlu2 %423 }
 0x152   :  { %v1926_v49 = vpop.permute.xlu1 %468 }
 0x155   :  { %v434_v39 = vpop.permute.xlu0 %433 }
 0x15a   :  { %v1963_v30 = vpop.permute.xlu1 %443 }
 0x15d   :  { %v429_v6 = vpop.permute.xlu0 %428 }
 0x17e   :  { %v575_v59 = vpop.f32.mrf.mxu0 }
 0x17f   :  { %v1908_v60 = vadd.f32 %v575_v59, %v424_v62 }
 0x181   :  { %2565 = vst [vmem:[#allocation5_spill] sm:$0xff] %v1908_v60  ;;  %v1919_v53 = vmul.f32 0.70710677, %v1908_v60 }
 0x183   :  { %2566 = vst [vmem:[#allocation6_spill] sm:$0xff] %v1919_v53  ;;  %v647_v18 = vmul.f32 %v1919_v53, %v1919_v53 }
 0x184   :  { %v590_v41 = vpop.f32.mrf.mxu2 }
 0x185   :  { %v1898_v61 = vadd.f32 %v590_v41, %v454_v51  ;;  %v605_v23 = vpop.f32.mrf.mxu3  ;;  %v1952_v55 = vmin.f32 %v647_v18, 16.0 }
 0x186   :  { %v1900_v63 = vadd.f32 %v605_v23, %v484_v56  ;;  %v577_v0 = vpop.f32.mrf.mxu0 }
 0x187   :  { %v1903_v2 = vmul.f32 0.70710677, %v1898_v61  ;;  %v1922_v42 = vadd.f32 %v577_v0, %v429_v6  ;;  %v649_v43 = vmul.f32 2.1237322e-06, %v1952_v55 }
 0x188   :  { %v1906_v3 = vmul.f32 0.70710677, %v1900_v63 }
 0x189   :  { %v887_v4 = vmul.f32 %v1903_v2, %v1903_v2  ;;  %2567 = vst [vmem:[#allocation7_spill] sm:$0xff] %v1922_v42  ;;  %v1937_v16 = vmul.f32 0.70710677, %v1922_v42  ;;  %v650_v41 = vadd.f32 0.00028619796, %v649_v43 }
 0x18a   :  { %v1127_v5 = vmul.f32 %v1906_v3, %v1906_v3 }
 0x18b   :  { %v1914_v8 = vmin.f32 %v887_v4, 16.0  ;;  %2568 = vst [vmem:[#allocation8_spill] sm:$0xff] %v1937_v16  ;;  %v687_v31 = vmul.f32 %v1937_v16, %v1937_v16 }
 0x18c   :  { %v1916_v52 = vmin.f32 %v1127_v5, 16.0  ;;  %v592_v9 = vpop.f32.mrf.mxu2 }
 0x18d   :  { %v889_v10 = vmul.f32 2.1237322e-06, %v1914_v8  ;;  %v1924_v44 = vadd.f32 %v592_v9, %v459_v54  ;;  %v607_v12 = vpop.f32.mrf.mxu3  ;;  %v1968_v46 = vmin.f32 %v687_v31, 16.0 }
 0x18e   :  { %v1129_v7 = vmul.f32 2.1237322e-06, %v1916_v52  ;;  %v1929_v32 = vadd.f32 %v607_v12, %v489_v35  ;;  %v580_v13 = vpop.f32.mrf.mxu0 }
 0x18f   :  { %v890_v37 = vadd.f32 0.00028619796, %v889_v10  ;;  %v1932_v15 = vmul.f32 0.70710677, %v1924_v44  ;;  %v1945_v17 = vadd.f32 %v580_v13, %v434_v39  ;;  %v689_v23 = vmul.f32 2.1237322e-06, %v1968_v46 }
 0x190   :  { %v1130_v14 = vadd.f32 0.00028619796, %v1129_v7  ;;  %v1940_v20 = vmul.f32 0.70710677, %v1929_v32 }
 0x191   :  { %v891_v21 = vmul.f32 %v890_v37, %v1914_v8  ;;  %v927_v24 = vmul.f32 %v1932_v15, %v1932_v15  ;;  %2569 = vst [vmem:[#allocation9_spill] sm:$0xff] %v1945_v17  ;;  %v1960_v27 = vmul.f32 0.70710677, %v1945_v17  ;;  %v651_v37 = vmul.f32 %v650_v41, %v1952_v55 }
 0x192   :  { %v1131_v25 = vmul.f32 %v1130_v14, %v1916_v52  ;;  %v1167_v26 = vmul.f32 %v1940_v20, %v1940_v20  ;;  %v690_v13 = vadd.f32 0.00028619796, %v689_v23  ;;  %v2021_v41 = vmul.f32 0.5, %v1924_v44 }
 0x193   :  { %v1950_v28 = vmin.f32 %v927_v24, 16.0  ;;  %v892_v36 = vadd.f32 0.0036580483, %v891_v21  ;;  %2570 = vst [vmem:[#allocation10_spill] sm:$0xff] %v1960_v27  ;;  %v727_v51 = vmul.f32 %v1960_v27, %v1960_v27  ;;  %v439_v21 = vpop.permute.xlu1 %438  ;;  %v652_v43 = vadd.f32 0.0036580483, %v651_v37 }
 0x194   :  { %v1956_v58 = vmin.f32 %v1167_v26, 16.0  ;;  %v595_v34 = vpop.f32.mrf.mxu2  ;;  %v1132_v11 = vadd.f32 0.0036580483, %v1131_v25  ;;  %v1999_v26 = vmul.f32 0.5, %v1898_v61  ;;  %v691_v61 = vmul.f32 %v690_v13, %v1968_v46 }
 0x195   :  { %v929_v38 = vmul.f32 2.1237322e-06, %v1950_v28  ;;  %v1965_v22 = vadd.f32 %v595_v34, %v464_v45  ;;  %v610_v33 = vpop.f32.mrf.mxu3  ;;  %v893_v35 = vmul.f32 %v892_v36, %v1914_v8  ;;  %v1983_v4 = vmin.f32 %v727_v51, 16.0 }
 0x196   :  { %v1169_v29 = vmul.f32 2.1237322e-06, %v1956_v58  ;;  %v1133_v54 = vmul.f32 %v1132_v11, %v1916_v52  ;;  %v1975_v56 = vadd.f32 %v610_v33, %v1892_v50  ;;  %v582_v62 = vpop.f32.mrf.mxu0  ;;  %v2038_v37 = vmul.f32 3.8918573e-05, %v1916_v52 }
 0x197   :  { %v930_v40 = vadd.f32 0.00028619796, %v929_v38  ;;  %v1980_v39 = vmul.f32 0.70710677, %v1965_v22  ;;  %v894_v0 = vadd.f32 0.05243302, %v893_v35  ;;  %v2004_v36 = vadd.f32 %v582_v62, %v439_v21 }
 0x198   :  { %v1170_v19 = vadd.f32 0.00028619796, %v1169_v29  ;;  %v1134_v6 = vadd.f32 0.05243302, %v1133_v54  ;;  %v1988_v50 = vmul.f32 0.70710677, %v1975_v56 }
 0x199   :  { %v931_v59 = vmul.f32 %v930_v40, %v1950_v28  ;;  %v967_v5 = vmul.f32 %v1980_v39, %v1980_v39  ;;  %v895_v18 = vmul.f32 %v894_v0, %v1914_v8  ;;  %v729_v24 = vmul.f32 2.1237322e-06, %v1983_v4  ;;  %2571 = vst [vmem:[#allocation11_spill] sm:$0xff] %v2004_v36 }
 0x19a   :  { %v1171_v45 = vmul.f32 %v1170_v19, %v1956_v58  ;;  %v1207_v14 = vmul.f32 %v1988_v50, %v1988_v50  ;;  %v1135_v31 = vmul.f32 %v1134_v6, %v1916_v52  ;;  %v2012_v19 = vmul.f32 0.5, %v1900_v63 }
 0x19b   :  { %v932_v9 = vadd.f32 0.0036580483, %v931_v59  ;;  %v1990_v12 = vmin.f32 %v967_v5, 16.0  ;;  %v896_v51 = vadd.f32 0.18741608, %v895_v18 }
 0x19c   :  { %v1172_v10 = vadd.f32 0.0036580483, %v1171_v45  ;;  %v597_v7 = vpop.f32.mrf.mxu2  ;;  %v2002_v34 = vmin.f32 %v1207_v14, 16.0  ;;  %v730_v54 = vadd.f32 0.00028619796, %v729_v24  ;;  %v2045_v24 = vmul.f32 0.5, %v1965_v22 }
 0x19d   :  { %v969_v25 = vmul.f32 2.1237322e-06, %v1990_v12  ;;  %v933_v38 = vmul.f32 %v932_v9, %v1950_v28  ;;  %v2009_v40 = vadd.f32 %v597_v7, %v1926_v49  ;;  %v612_v33 = vpop.f32.mrf.mxu3  ;;  %v2018_v45 = vmul.f32 0.70710677, %v2004_v36 }
 0x19e   :  { %v1173_v11 = vmul.f32 %v1172_v10, %v1956_v58  ;;  %v1209_v35 = vmul.f32 2.1237322e-06, %v2002_v34  ;;  %v2027_v63 = vadd.f32 %v612_v33, %v1888_v47  ;;  %v585_v62 = vpop.f32.mrf.mxu0  ;;  %v1136_v0 = vadd.f32 0.18741608, %v1135_v31 }
 0x19f   :  { %v970_v29 = vadd.f32 0.00028619796, %v969_v25  ;;  %2572 = vst [vmem:[#allocation12_spill] sm:$0xff] %v2018_v45  ;;  %v2024_v23 = vmul.f32 0.70710677, %v2009_v40  ;;  %v767_v9 = vmul.f32 %v2018_v45, %v2018_v45  ;;  %v2032_v10 = vmul.f32 0.5, %v1929_v32 }
 0x1a0   :  { %v1210_v49 = vadd.f32 0.00028619796, %v1209_v35  ;;  %v934_v5 = vadd.f32 0.05243302, %v933_v38  ;;  %v1174_v6 = vadd.f32 0.05243302, %v1173_v11  ;;  %v897_v47 = vmul.f32 %v896_v51, %v1914_v8 }
 0x1a1   :  { %v971_v59 = vmul.f32 %v970_v29, %v1990_v12  ;;  %v1007_v7 = vmul.f32 %v2024_v23, %v2024_v23  ;;  %v2041_v13 = vadd.f32 0.0036580483, %v691_v61  ;;  %v731_v14 = vmul.f32 %v730_v54, %v1983_v4 }
 0x1a2   :  { %v1211_v44 = vmul.f32 %v1210_v49, %v2002_v34  ;;  %v2047_v32 = vmin.f32 %v767_v9, 16.0  ;;  %v2052_v31 = vmul.f32 0.70710677, %v2027_v63  ;;  %v1137_v38 = vmul.f32 %v1136_v0, %v1916_v52 }
 0x1a3   :  { %2573 = vst [vmem:[#allocation13_spill] sm:$0xff] %v2041_v13  ;;  %v972_v18 = vadd.f32 0.0036580483, %v971_v59  ;;  %v2049_v25 = vmin.f32 %v1007_v7, 16.0  ;;  %v935_v11 = vmul.f32 %v934_v5, %v1950_v28  ;;  %v1175_v29 = vmul.f32 %v1174_v6, %v1956_v58 }
 0x1a4   :  { %v600_v21 = vpop.f32.mrf.mxu2  ;;  %v2058_v33 = vadd.f32 %v585_v62, %v1963_v30  ;;  %v1212_v61 = vadd.f32 0.0036580483, %v1211_v44  ;;  %v1247_v35 = vmul.f32 %v2052_v31, %v2052_v31  ;;  %v898_v54 = vadd.f32 1.1283791, %v897_v47 }
 0x1a5   :  { %v1009_v22 = vmul.f32 2.1237322e-06, %v2049_v25  ;;  %v2064_v51 = vadd.f32 %v600_v21, %v1890_v48  ;;  %v732_v59 = vadd.f32 0.0036580483, %v731_v14  ;;  %v973_v49 = vmul.f32 %v972_v18, %v1990_v12 }
 0x1a6   :  { %2574 = vst [vmem:[#allocation14_spill] sm:$0xff] %v2058_v33  ;;  %v2068_v0 = vmul.f32 0.70710677, %v2058_v33  ;;  %v2071_v5 = vmul.f32 0.5, %v1975_v56  ;;  %v769_v30 = vmul.f32 2.1237322e-06, %v2047_v32  ;;  %v1213_v14 = vmul.f32 %v1212_v61, %v2002_v34  ;;  %v587_v21 = vpop.f32.mrf.mxu0 }
 0x1a7   :  { %v1010_v62 = vadd.f32 0.00028619796, %v1009_v22  ;;  %v2074_v6 = vmin.f32 %v1247_v35, 16.0  ;;  %v1138_v9 = vadd.f32 1.1283791, %v1137_v38  ;;  %v733_v22 = vmul.f32 %v732_v59, %v1983_v4 }
 0x1a8   :  { %v936_v44 = vadd.f32 0.18741608, %v935_v11  ;;  %v807_v48 = vmul.f32 %v2068_v0, %v2068_v0  ;;  %v2079_v7 = vmul.f32 0.70710677, %v2064_v51  ;;  %v1176_v47 = vadd.f32 0.18741608, %v1175_v29 }
 0x1a9   :  { %v1011_v18 = vmul.f32 %v1010_v62, %v2049_v25  ;;  %v1249_v56 = vmul.f32 2.1237322e-06, %v2074_v6  ;;  %v974_v35 = vadd.f32 0.05243302, %v973_v49  ;;  %v2090_v11 = vmul.f32 %v652_v43, %v1952_v55 }
 0x1aa   :  { %v2085_v42 = vmin.f32 %v807_v48, 16.0  ;;  %v1047_v38 = vmul.f32 %v2079_v7, %v2079_v7  ;;  %v770_v60 = vadd.f32 0.00028619796, %v769_v30  ;;  %v937_v61 = vmul.f32 %v936_v44, %v1950_v28 }
 0x1ab   :  { %2575 = vst [vmem:[#allocation15_spill] sm:$0xff] %v2090_v11  ;;  %v1012_v29 = vadd.f32 0.0036580483, %v1011_v18  ;;  %v1250_v16 = vadd.f32 0.00028619796, %v1249_v56  ;;  %v2097_v59 = vadd.f32 %v587_v21, %v1894_v57  ;;  %v1177_v48 = vmul.f32 %v1176_v47, %v1956_v58 }
 0x1ac   :  { %v809_v62 = vmul.f32 2.1237322e-06, %v2085_v42  ;;  %v2094_v36 = vmin.f32 %v1047_v38, 16.0  ;;  %v602_v49 = vpop.f32.mrf.mxu2  ;;  %v1214_v53 = vadd.f32 0.05243302, %v1213_v14  ;;  %v2103_v30 = vmul.f32 %v898_v54, %v1903_v2 }
 0x1ad   :  { %2576 = vst [vmem:[#allocation16_spill] sm:$0xff] %v2097_v59  ;;  %v1013_v17 = vmul.f32 %v1012_v29, %v2049_v25  ;;  %v1251_v43 = vmul.f32 %v1250_v16, %v2074_v6  ;;  %v734_v18 = vadd.f32 0.05243302, %v733_v22  ;;  %v975_v38 = vmul.f32 %v974_v35, %v1990_v12 }
 0x1ae   :  { %v810_v44 = vadd.f32 0.00028619796, %v809_v62  ;;  %v1049_v56 = vmul.f32 2.1237322e-06, %v2094_v36  ;;  %v771_v57 = vmul.f32 %v770_v60, %v2047_v32  ;;  %v2109_v45 = vadd.f32 %v602_v49, %v1896_v1 }
 0x1af   :  { %v1014_v21 = vadd.f32 0.05243302, %v1013_v17  ;;  %v1252_v47 = vadd.f32 0.0036580483, %v1251_v43  ;;  %v2113_v16 = vmul.f32 0.70710677, %v2097_v59  ;;  %v2116_v2 = vmul.f32 %v1138_v9, %v1906_v3 }
 0x1b0   :  { %v811_v14 = vmul.f32 %v810_v44, %v2085_v42  ;;  %v1050_v29 = vadd.f32 0.00028619796, %v1049_v56  ;;  %v938_v54 = vadd.f32 1.1283791, %v937_v61  ;;  %v1178_v22 = vadd.f32 1.1283791, %v1177_v48 }
 0x1b1   :  { %2577 = vst [vmem:[#allocation17_spill] sm:$0xff] %v2113_v16  ;;  %v1215_v35 = vmul.f32 %v1214_v53, %v2002_v34  ;;  %v1015_v60 = vmul.f32 %v1014_v21, %v2049_v25  ;;  %v847_v62 = vmul.f32 %v2113_v16, %v2113_v16  ;;  %v2124_v49 = vmul.f32 %v734_v18, %v1983_v4 }
 0x1b2   :  { %v812_v17 = vadd.f32 0.0036580483, %v811_v14  ;;  %v1051_v1 = vmul.f32 %v1050_v29, %v2094_v36  ;;  %v976_v43 = vadd.f32 0.18741608, %v975_v38  ;;  %v772_v44 = vadd.f32 0.0036580483, %v771_v57 }
 0x1b3   :  { %2578 = vst [vmem:[#allocation18_spill] sm:$0xff] %v2124_v49  ;;  %v2127_v3 = vmul.f32 0.70710677, %v2109_v45  ;;  %v1253_v9 = vmul.f32 %v1252_v47, %v2074_v6  ;;  %v2131_v48 = vmin.f32 %v847_v62, 16.0  ;;  %v1216_v56 = vadd.f32 0.18741608, %v1215_v35 }
 0x1b4   :  { %v813_v53 = vmul.f32 %v812_v17, %v2085_v42  ;;  %v1052_v61 = vadd.f32 0.0036580483, %v1051_v1  ;;  %v2134_v21 = vmul.f32 0.5, %v2009_v40  ;;  %v1220_v38 = vmul.f32 3.8918573e-05, %v2002_v34 }
 0x1b5   :  { %v1087_v18 = vmul.f32 %v2127_v3, %v2127_v3  ;;  %v1016_v57 = vadd.f32 0.18741608, %v1015_v60  ;;  %v2140_v14 = vmul.f32 0.5, %v2027_v63  ;;  %v849_v29 = vmul.f32 2.1237322e-06, %v2131_v48 }
 0x1b6   :  { %v1053_v47 = vmul.f32 %v1052_v61, %v2094_v36  ;;  %v2145_v17 = vmul.f32 %v938_v54, %v1932_v15  ;;  %v2148_v35 = vmul.f32 %v1178_v22, %v1940_v20  ;;  %v977_v40 = vmul.f32 %v976_v43, %v1990_v12 }
 0x1b7   :  { %v2151_v1 = vmin.f32 %v1087_v18, 16.0  ;;  %v773_v62 = vmul.f32 %v772_v44, %v2047_v32  ;;  %v1254_v60 = vadd.f32 0.05243302, %v1253_v9  ;;  %v814_v27 = vadd.f32 0.05243302, %v813_v53 }
 0x1b8   :  { %v850_v63 = vadd.f32 0.00028619796, %v849_v29  ;;  %v1217_v59 = vmul.f32 %v1216_v56, %v2002_v34  ;;  %v2156_v61 = vmul.f32 0.5, %v2064_v51  ;;  %v1221_v54 = vadd.f32 0.001143296, %v1220_v38 }
 0x1b9   :  { %v1089_v15 = vmul.f32 2.1237322e-06, %v2151_v1  ;;  %v1017_v20 = vmul.f32 %v1016_v57, %v2049_v25  ;;  %v1054_v22 = vadd.f32 0.05243302, %v1053_v47  ;;  %v1260_v18 = vmul.f32 3.8918573e-05, %v2074_v6 }
 0x1ba   :  { %v851_v43 = vmul.f32 %v850_v63, %v2131_v48  ;;  %v978_v33 = vadd.f32 1.1283791, %v977_v40  ;;  %v1222_v9 = vmul.f32 %v1221_v54, %v2002_v34  ;;  %v1141_v53 = vadd.f32 0.001143296, %v2038_v37 }
 0x1bb   :  { %v1090_v44 = vadd.f32 0.00028619796, %v1089_v15  ;;  %v774_v56 = vadd.f32 0.05243302, %v773_v62  ;;  %v1255_v51 = vmul.f32 %v1254_v60, %v2074_v6  ;;  %v815_v29 = vmul.f32 %v814_v27, %v2085_v42 }
 0x1bc   :  { %v1261_v49 = vadd.f32 0.001143296, %v1260_v18  ;;  %v1218_v38 = vadd.f32 1.1283791, %v1217_v59  ;;  %v1223_v47 = vadd.f32 0.014752088, %v1222_v9  ;;  %v1142_v63 = vmul.f32 %v1141_v53, %v1916_v52 }
 0x1bd   :  { %v1091_v57 = vmul.f32 %v1090_v44, %v2151_v1  ;;  %v1018_v13 = vadd.f32 1.1283791, %v1017_v20  ;;  %v1055_v40 = vmul.f32 %v1054_v22, %v2094_v36  ;;  %v852_v15 = vadd.f32 0.0036580483, %v851_v43 }
 0x1be   :  { %v1262_v54 = vmul.f32 %v1261_v49, %v2074_v6  ;;  %v1224_v37 = vmul.f32 %v1223_v47, %v2002_v34  ;;  %v1143_v62 = vadd.f32 0.014752088, %v1142_v63  ;;  %v1180_v60 = vmul.f32 3.8918573e-05, %v1956_v58 }
 0x1bf   :  { %v1092_v11 = vadd.f32 0.0036580483, %v1091_v57  ;;  %v2173_v27 = vmul.f32 %v978_v33, %v1980_v39  ;;  %v1256_v59 = vadd.f32 0.18741608, %v1255_v51  ;;  %v816_v18 = vadd.f32 0.18741608, %v815_v29 }
 0x1c0   :  { %v1263_v44 = vadd.f32 0.014752088, %v1262_v54  ;;  %v1225_v20 = vadd.f32 0.112945676, %v1224_v37  ;;  %v1144_v22 = vmul.f32 %v1143_v62, %v1916_v52  ;;  %v1181_v43 = vadd.f32 0.001143296, %v1180_v60 }
 0x1c1   :  { %v1093_v9 = vmul.f32 %v1092_v11, %v2151_v1  ;;  %v1056_v53 = vadd.f32 0.18741608, %v1055_v40  ;;  %v853_v49 = vmul.f32 %v852_v15, %v2131_v48  ;;  %v1060_v47 = vmul.f32 3.8918573e-05, %v2094_v36 }
 0x1c2   :  { %v1264_v57 = vmul.f32 %v1263_v44, %v2074_v6  ;;  %v1226_v39 = vmul.f32 %v1225_v20, %v2002_v34  ;;  %v1145_v33 = vadd.f32 0.112945676, %v1144_v22  ;;  %v1182_v51 = vmul.f32 %v1181_v43, %v1956_v58 }
 0x1c3   :  { %v1094_v63 = vadd.f32 0.05243302, %v1093_v9  ;;  %v1257_v29 = vmul.f32 %v1256_v59, %v2074_v6  ;;  %v817_v11 = vmul.f32 %v816_v18, %v2085_v42  ;;  %v1061_v37 = vadd.f32 0.001143296, %v1060_v47 }
 0x1c4   :  { %v1265_v54 = vadd.f32 0.112945676, %v1264_v57  ;;  %v1227_v62 = vadd.f32 0.4994258, %v1226_v39  ;;  %v1146_v15 = vmul.f32 %v1145_v33, %v1916_v52  ;;  %v1183_v60 = vadd.f32 0.014752088, %v1182_v51 }
 0x1c5   :  { %v1095_v40 = vmul.f32 %v1094_v63, %v2151_v1  ;;  %v1057_v44 = vmul.f32 %v1056_v53, %v2094_v36  ;;  %v1062_v20 = vmul.f32 %v1061_v37, %v2094_v36  ;;  %v1100_v22 = vmul.f32 3.8918573e-05, %v2151_v1 }
 0x1c6   :  { %v1266_v9 = vmul.f32 %v1265_v54, %v2074_v6  ;;  %v854_v43 = vadd.f32 0.05243302, %v853_v49  ;;  %v1228_v59 = vmul.f32 %v1227_v62, %v2002_v34  ;;  %v1147_v18 = vadd.f32 0.4994258, %v1146_v15 }
 0x1c7   :  { %v1184_v57 = vmul.f32 %v1183_v60, %v1956_v58  ;;  %v2193_v47 = vmul.f32 %v774_v56, %v2047_v32  ;;  %v1096_v63 = vadd.f32 0.18741608, %v1095_v40  ;;  %v1063_v33 = vadd.f32 0.014752088, %v1062_v20 }
 0x1c8   :  { %v1267_v39 = vadd.f32 0.4994258, %v1266_v9  ;;  %v1258_v51 = vadd.f32 1.1283791, %v1257_v29  ;;  %v2195_v53 = vadd.f32 1.0, %v1228_v59  ;;  %v1148_v54 = vmul.f32 %v1147_v18, %v1916_v52 }
 0x1c9   :  { %2579 = vst [vmem:[#allocation19_spill] sm:$0xff] %v2193_v47  ;;  %v1185_v37 = vadd.f32 0.112945676, %v1184_v57  ;;  %v818_v16 = vadd.f32 1.1283791, %v817_v11  ;;  %v1064_v34 = vmul.f32 %v1063_v33, %v2094_v36  ;;  %v2201_v15 = vmul.f32 %v1218_v38, %v1988_v50 }
 0x1ca   :  { %v1268_v49 = vmul.f32 %v1267_v39, %v2074_v6  ;;  %v1101_v62 = vadd.f32 0.001143296, %v1100_v22  ;;  %v1058_v56 = vadd.f32 1.1283791, %v1057_v44  ;;  %v855_v40 = vmul.f32 %v854_v43, %v2131_v48 }
 0x1cb   :  { %1494 = vrcp.f32 %v2195_v53  ;;  %v1097_v29 = vmul.f32 %v1096_v63, %v2151_v1  ;;  %v2208_v52 = vadd.f32 1.0, %v1148_v54  ;;  %v1186_v11 = vmul.f32 %v1185_v37, %v1956_v58 }
 0x1cc   :  { %v2206_v60 = vadd.f32 1.0, %v1268_v49  ;;  %v2212_v6 = vmul.f32 %v1018_v13, %v2024_v23  ;;  %v2215_v9 = vmul.f32 0.5, %v2109_v45  ;;  %v1065_v50 = vadd.f32 0.112945676, %v1064_v34 }
 0x1cd   :  { %v1102_v38 = vmul.f32 %v1101_v62, %v2151_v1  ;;  %v2219_v44 = vmul.f32 %v1258_v51, %v2052_v31  ;;  %v2222_v20 = vmul.f32 %v818_v16, %v2068_v0  ;;  %v1239_v22 = vand.u32 2147483647, %v2195_v53 }
 0x1ce   :  { %1496 = vrcp.f32 %v2206_v60  ;;  %v2227_v43 = vmul.f32 %v1058_v56, %v2079_v7  ;;  %v2229_v23 = vadd.f32 0.18741608, %v855_v40  ;;  %v1241_v45 = vand.u32 2147483648, %v2195_v53 }
 0x1cf   :  { %2580 = vst [vmem:[#allocation20_spill] sm:$0xff] %v2222_v20  ;;  %1498 = vrcp.f32 %v2208_v52  ;;  %v2233_v13 = vadd.f32 1.1283791, %v1097_v29  ;;  %v1281_v31 = vand.u32 2147483648, %v2206_v60  ;;  %v1187_v59 = vadd.f32 0.4994258, %v1186_v11 }
 0x1d0   :  { %v1066_v0 = vmul.f32 %v1065_v50, %v2094_v36  ;;  %vm1235_vm1 = vweird.f32 %v2195_v53  ;;  %v1279_v18 = vand.u32 2147483647, %v2206_v60  ;;  %v1103_v7 = vadd.f32 0.014752088, %v1102_v38 }
 0x1d1   :  { %v1495_v16 = vpop.eup %1494  ;;  %v980_v57 = vmul.f32 3.8918573e-05, %v1990_v12  ;;  %vm2241_vm2 = vcmp.eq.f32.partialorder %v1239_v22, 8.507059e+37  ;;  %v1159_v33 = vand.u32 2147483647, %v2208_v52  ;;  %v1161_v51 = vand.u32 2147483648, %v2208_v52 }
 0x1d2   :  { %v1231_v63 = vmul.f32 %v1495_v16, %v2195_v53  ;;  %v1188_v54 = vmul.f32 %v1187_v59, %v1956_v58  ;;  %v1242_v37 = vor.u32 1.1754944e-38, %v1241_v45  ;;  %vm1275_vm3 = vweird.f32 %v2206_v60 }
 0x1d3   :  { %v1067_v49 = vadd.f32 0.4994258, %v1066_v0  ;;  %v1104_v34 = vmul.f32 %v1103_v7, %v2151_v1  ;;  %vm1236_vm4 = vweird.f32 %v1495_v16  ;;  %v1282_v40 = vor.u32 1.1754944e-38, %v1281_v31 }
 0x1d4   :  { %v1497_v62 = vpop.eup %1496  ;;  %v1232_v56 = vsub.f32 1.0, %v1231_v63  ;;  %vm1155_vm5 = vweird.f32 %v2208_v52  ;;  %v2251_v29 = vadd.f32 1.0, %v1188_v54  ;;  %vm2254_vm6 = vcmp.eq.f32.partialorder %v1279_v18, 8.507059e+37  ;;  %vm1237_vm9 = vmor %vm1235_vm1, %vm1236_vm4 }
 0x1d5   :  { %v1499_v11 = vpop.eup %1498  ;;  %v1271_v50 = vmul.f32 %v1497_v62, %v2206_v60  ;;  %v1068_v58 = vmul.f32 %v1067_v49, %v2094_v36  ;;  %v1105_v22 = vadd.f32 0.112945676, %v1104_v34  ;;  %v981_v45 = vadd.f32 0.001143296, %v980_v57 }
 0x1d6   :  { %v1233_v59 = vmul.f32 %v1495_v16, %v1232_v56  ;;  %v1151_v0 = vmul.f32 %v1499_v11, %v2208_v52  ;;  %vm2260_vm7 = vcmp.eq.f32.partialorder %v1159_v33, 8.507059e+37  ;;  %v1162_v7 = vor.u32 1.1754944e-38, %v1161_v51 }
 0x1d7   :  { %1500 = vrcp.f32 %v2251_v29  ;;  %v1272_v63 = vsub.f32 1.0, %v1271_v50  ;;  %vm1276_vm8 = vweird.f32 %v1497_v62  ;;  %v1020_v18 = vmul.f32 3.8918573e-05, %v2049_v25 }
 0x1d8   :  { %v2267_v54 = vmul.f32 3.8918573e-05, %v1914_v8  ;;  %v1234_v36 = vadd.f32 %v1495_v16, %v1233_v59  ;;  %v1152_v49 = vsub.f32 1.0, %v1151_v0  ;;  %v2269_v57 = vadd.f32 1.0, %v1068_v58  ;;  %vm1277_vm12 = vmor %vm1275_vm3, %vm1276_vm8 }
 0x1d9   :  { %v1106_v34 = vmul.f32 %v1105_v22, %v2151_v1  ;;  %v1273_v33 = vmul.f32 %v1497_v62, %v1272_v63  ;;  %v1199_v51 = vand.u32 2147483647, %v2251_v29  ;;  %v1201_v56 = vand.u32 2147483648, %v2251_v29 }
 0x1da   :  { %v982_v50 = vmul.f32 %v981_v45, %v1990_v12  ;;  %v1238_v47 = vsel %vm1237_vm9, %v1495_v16, %v1234_v36  ;;  %v1153_v20 = vmul.f32 %v1499_v11, %v1152_v49  ;;  %vm1156_vm10 = vweird.f32 %v1499_v11 }
 0x1db   :  { %1502 = vrcp.f32 %v2269_v57  ;;  %v1243_v58 = vsel %vm2241_vm2, %v1242_v37, %v1238_v47  ;;  %v1274_v22 = vadd.f32 %v1497_v62, %v1273_v33  ;;  %vm1195_vm11 = vweird.f32 %v2251_v29  ;;  %vm1157_vm13 = vmor %vm1155_vm5, %vm1156_vm10 }
 0x1dc   :  { %v2283_v53 = vmul.f32 3.8918573e-05, %v1950_v28  ;;  %v1244_v0 = vmul.f32 %v1243_v58, %v2201_v15  ;;  %v1154_v16 = vadd.f32 %v1499_v11, %v1153_v20  ;;  %v1107_v45 = vadd.f32 0.4994258, %v1106_v34 }
 0x1dd   :  { %v1501_v59 = vpop.eup %1500  ;;  %v983_v63 = vadd.f32 0.014752088, %v982_v50  ;;  %v1278_v36 = vsel %vm1277_vm12, %v1497_v62, %v1274_v22  ;;  %vm2292_vm14 = vcmp.eq.f32.partialorder %v1199_v51, 8.507059e+37  ;;  %v1202_v37 = vor.u32 1.1754944e-38, %v1201_v56 }
 0x1de   :  { %v1191_v47 = vmul.f32 %v1501_v59, %v2251_v29  ;;  %v1442_v49 = vclamps-f32 %v1244_v0, 1.0  ;;  %v1283_v15 = vsel %vm2254_vm6, %v1282_v40, %v1278_v36  ;;  %v1158_v60 = vsel %vm1157_vm13, %v1499_v11, %v1154_v16 }
 0x1df   :  { %v1079_v20 = vand.u32 2147483647, %v2269_v57  ;;  %v1284_v34 = vmul.f32 %v1283_v15, %v2219_v44  ;;  %v1163_v52 = vsel %vm2260_vm7, %v1162_v7, %v1158_v60  ;;  %v1108_v33 = vmul.f32 %v1107_v45, %v2151_v1 }
 0x1e0   :  { %v1192_v62 = vsub.f32 1.0, %v1191_v47  ;;  %v1164_v50 = vmul.f32 %v1163_v52, %v2116_v2  ;;  %vm1196_vm15 = vweird.f32 %v1501_v59  ;;  %v984_v56 = vmul.f32 %v983_v63, %v1990_v12 }
 0x1e1   :  { %v1503_v51 = vpop.eup %1502  ;;  %v1021_v58 = vadd.f32 0.001143296, %v1020_v18  ;;  %v1443_v38 = vclamps-f32 %v1284_v34, 1.0  ;;  %v1301_v40 = vadd.f32 1.0, %v1442_v49  ;;  %v1081_v44 = vand.u32 2147483648, %v2269_v57  ;;  %vm1197_vm1 = vmor %vm1195_vm11, %vm1196_vm15 }
 0x1e2   :  { %v1193_v11 = vmul.f32 %v1501_v59, %v1192_v62  ;;  %v1071_v22 = vmul.f32 %v1503_v51, %v2269_v57  ;;  %v1440_v0 = vclamps-f32 %v1164_v50, 1.0  ;;  %v2307_v31 = vadd.f32 1.0, %v1108_v33 }
 0x1e3   :  { %v985_v7 = vadd.f32 0.112945676, %v984_v56  ;;  %v1302_v16 = vadd.f32 1.0, %v1443_v38  ;;  %vm1075_vm0 = vweird.f32 %v2269_v57  ;;  %vm1076_vm2 = vweird.f32 %v1503_v51 }
 0x1e4   :  { %v1194_v1 = vadd.f32 %v1501_v59, %v1193_v11  ;;  %v1072_v45 = vsub.f32 1.0, %v1071_v22  ;;  %vm2313_vm3 = vcmp.eq.f32.partialorder %v1079_v20, 8.507059e+37  ;;  %1504 = vrcp.f32 %v2307_v31  ;;  %vm1077_vm4 = vmor %vm1075_vm0, %vm1076_vm2 }
 0x1e5   :  { %v1022_v18 = vmul.f32 %v1021_v58, %v2049_v25  ;;  %v1317_v63 = vmul.f32 %v1301_v40, %v2071_v5  ;;  %v1318_v36 = vmul.f32 %v1302_v16, %v2140_v14  ;;  %v1299_v29 = vadd.f32 1.0, %v1440_v0 }
 0x1e6   :  { %v1198_v47 = vsel %vm1197_vm1, %v1501_v59, %v1194_v1  ;;  %v1073_v49 = vmul.f32 %v1503_v51, %v1072_v45  ;;  %v1082_v60 = vor.u32 1.1754944e-38, %v1081_v44  ;;  %v986_v20 = vmul.f32 %v985_v7, %v1990_v12 }
 0x1e7   :  { %v1203_v15 = vsel %vm2292_vm14, %v1202_v37, %v1198_v47  ;;  %v1327_v34 = vpack.c.bf16 %v1318_v36, %v1317_v63  ;;  %v1119_v33 = vand.u32 2147483647, %v2307_v31  ;;  %v857_v5 = vmul.f32 %v2229_v23, %v2131_v48 }
 0x1e8   :  { %v1204_v52 = vmul.f32 %v1203_v15, %v2148_v35  ;;  %v1074_v62 = vadd.f32 %v1503_v51, %v1073_v49  ;;  %v987_v14 = vadd.f32 0.4994258, %v986_v20  ;;  %v1023_v59 = vadd.f32 0.014752088, %v1022_v18 }
 0x1e9   :  { %v901_v39 = vadd.f32 0.001143296, %v2267_v54  ;;  %1334 = vmatpush.bf16.msra.mxu1 %v1327_v34  ;;  %v941_v56 = vadd.f32 0.001143296, %v2283_v53  ;;  %v820_v35 = vmul.f32 3.8918573e-05, %v2085_v42  ;;  %v1315_v54 = vmul.f32 %v1299_v29, %v2012_v19 }
 0x1ea   :  { %v1441_v37 = vclamps-f32 %v1204_v52, 1.0  ;;  %v1078_v50 = vsel %vm1077_vm4, %v1503_v51, %v1074_v62  ;;  %v1505_v58 = vpop.eup %1504  ;;  %v988_v23 = vmul.f32 %v987_v14, %v1990_v12  ;;  %v1024_v57 = vmul.f32 %v1023_v59, %v2049_v25 }
 0x1eb   :  { %v1083_v38 = vsel %vm2313_vm3, %v1082_v60, %v1078_v50  ;;  %v902_v40 = vmul.f32 %v901_v39, %v1914_v8  ;;  %v1111_v22 = vmul.f32 %v1505_v58, %v2307_v31  ;;  %v1121_v51 = vand.u32 2147483648, %v2307_v31 }
 0x1ec   :  { %v1300_v11 = vadd.f32 1.0, %v1441_v37  ;;  %v2342_v53 = vadd.f32 1.0, %v988_v23  ;;  %v1025_v0 = vadd.f32 0.112945676, %v1024_v57  ;;  %v942_v7 = vmul.f32 %v941_v56, %v1950_v28 }
 0x1ed   :  { %v903_v44 = vadd.f32 0.014752088, %v902_v40  ;;  %v1084_v12 = vmul.f32 %v1083_v38, %v2227_v43  ;;  %v1112_v1 = vsub.f32 1.0, %v1111_v22  ;;  %v821_v45 = vadd.f32 0.001143296, %v820_v35 }
 0x1ee   :  { %v1316_v16 = vmul.f32 %v1300_v11, %v2032_v10  ;;  %v2347_v2 = vadd.f32 1.1283791, %v857_v5  ;;  %v1099_v19 = vmul.f32 %v2233_v13, %v2127_v3  ;;  %vm1115_vm5 = vweird.f32 %v2307_v31 }
 0x1ef   :  { %1506 = vrcp.f32 %v2342_v53  ;;  %v1113_v63 = vmul.f32 %v1505_v58, %v1112_v1  ;;  %vm1116_vm6 = vweird.f32 %v1505_v58  ;;  %v1026_v36 = vmul.f32 %v1025_v0, %v2049_v25 }
 0x1f0   :  { %v1326_v18 = vpack.c.bf16 %v1316_v16, %v1315_v54  ;;  %vm2354_vm7 = vcmp.eq.f32.partialorder %v1119_v33, 8.507059e+37  ;;  %v1122_v43 = vor.u32 1.1754944e-38, %v1121_v51  ;;  %v904_v47 = vmul.f32 %v903_v44, %v1914_v8  ;;  %vm1117_vm8 = vmor %vm1115_vm5, %vm1116_vm6 }
 0x1f1   :  { %v943_v49 = vadd.f32 0.014752088, %v942_v7  ;;  %v1438_v15 = vclamps-f32 %v1084_v12, 1.0  ;;  %v1114_v3 = vadd.f32 %v1505_v58, %v1113_v63  ;;  %v1027_v13 = vadd.f32 0.4994258, %v1026_v36 }
 0x1f2   :  { %1335 = vmatpush.bf16.msra.mxu1 %v1326_v18  ;;  %v822_v29 = vmul.f32 %v821_v45, %v2085_v42  ;;  %v999_v60 = vand.u32 2147483647, %v2342_v53  ;;  %v905_v20 = vadd.f32 0.112945676, %v904_v47  ;;  %v860_v52 = vmul.f32 3.8918573e-05, %v2131_v48 }
 0x1f3   :  { %v944_v34 = vmul.f32 %v943_v49, %v1950_v28  ;;  %v1118_v62 = vsel %vm1117_vm8, %v1505_v58, %v1114_v3  ;;  %v1001_v33 = vand.u32 2147483648, %v2342_v53  ;;  %v1028_v5 = vmul.f32 %v1027_v13, %v2049_v25 }
 0x1f4   :  { %v823_v14 = vadd.f32 0.014752088, %v822_v29  ;;  %v1123_v39 = vsel %vm2354_vm7, %v1122_v43, %v1118_v62  ;;  %v906_v31 = vmul.f32 %v905_v20, %v1914_v8  ;;  %v861_v50 = vadd.f32 0.001143296, %v860_v52 }
 0x1f5   :  { %v1507_v59 = vpop.eup %1506  ;;  %v945_v37 = vadd.f32 0.112945676, %v944_v34  ;;  %v1124_v56 = vmul.f32 %v1123_v39, %v1099_v19  ;;  %v1297_v35 = vadd.f32 1.0, %v1438_v15  ;;  %v2371_v23 = vadd.f32 1.0, %v1028_v5 }
 0x1f6   :  { %v991_v38 = vmul.f32 %v1507_v59, %v2342_v53  ;;  %v907_v58 = vadd.f32 0.4994258, %v906_v31  ;;  %v824_v25 = vmul.f32 %v823_v14, %v2085_v42  ;;  %v862_v40 = vmul.f32 %v861_v50, %v2131_v48 }
 0x1f7   :  { %v946_v57 = vmul.f32 %v945_v37, %v1950_v28  ;;  %v1439_v11 = vclamps-f32 %v1124_v56, 1.0  ;;  %vm995_vm9 = vweird.f32 %v2342_v53  ;;  %1508 = vrcp.f32 %v2371_v23 }
 0x1f8   :  { %v992_v54 = vsub.f32 1.0, %v991_v38  ;;  %vm996_vm10 = vweird.f32 %v1507_v59  ;;  %vm2378_vm11 = vcmp.eq.f32.partialorder %v999_v60, 8.507059e+37  ;;  %v908_v51 = vmul.f32 %v907_v58, %v1914_v8 }
 0x1f9   :  { %v947_v0 = vadd.f32 0.4994258, %v946_v57  ;;  %v1298_v44 = vadd.f32 1.0, %v1439_v11  ;;  %v825_v16 = vadd.f32 0.112945676, %v824_v25  ;;  %v1313_v1 = vmul.f32 %v1297_v35, %v2156_v61  ;;  %vm997_vm12 = vmor %vm995_vm9, %vm996_vm10 }
 0x1fa   :  { %v993_v7 = vmul.f32 %v1507_v59, %v992_v54  ;;  %v863_v12 = vadd.f32 0.014752088, %v862_v40  ;;  %v1002_v45 = vor.u32 1.1754944e-38, %v1001_v33  ;;  %v2384_v19 = vadd.f32 1.0, %v908_v51 }
 0x1fb   :  { %v948_v18 = vmul.f32 %v947_v0, %v1950_v28  ;;  %v1314_v63 = vmul.f32 %v1298_v44, %v2215_v9  ;;  %v826_v10 = vmul.f32 %v825_v16, %v2085_v42  ;;  %v740_v43 = vmul.f32 3.8918573e-05, %v1983_v4 }
 0x1fc   :  { %v994_v36 = vadd.f32 %v1507_v59, %v993_v7  ;;  %v1039_v8 = vand.u32 2147483647, %v2371_v23  ;;  %v1041_v61 = vand.u32 2147483648, %v2371_v23  ;;  %1510 = vrcp.f32 %v2384_v19 }
 0x1fd   :  { %v864_v47 = vmul.f32 %v863_v12, %v2131_v48  ;;  %v1509_v28 = vpop.eup %1508  ;;  %v1325_v49 = vpack.c.bf16 %v1314_v63, %v1313_v1  ;;  %v2397_v15 = vadd.f32 1.0, %v948_v18  ;;  %v827_v3 = vadd.f32 0.4994258, %v826_v10 }
 0x1fe   :  { %v998_v9 = vsel %vm997_vm12, %v1507_v59, %v994_v36  ;;  %v1031_v53 = vmul.f32 %v1509_v28, %v2371_v23  ;;  %vm1035_vm13 = vweird.f32 %v2371_v23  ;;  %v780_v29 = vmul.f32 3.8918573e-05, %v2047_v32 }
 0x1ff   :  { %v1003_v13 = vsel %vm2378_vm11, %v1002_v45, %v998_v9  ;;  %1336 = vmatpush.bf16.msra.mxu1 %v1325_v49  ;;  %v919_v20 = vand.u32 2147483647, %v2384_v19  ;;  %v921_v34 = vand.u32 2147483648, %v2384_v19  ;;  %1512 = vrcp.f32 %v2397_v15 }
 0x200   :  { %v1004_v60 = vmul.f32 %v1003_v13, %v2173_v27  ;;  %v1032_v52 = vsub.f32 1.0, %v1031_v53  ;;  %vm2408_vm14 = vcmp.eq.f32.partialorder %v1039_v8, 8.507059e+37  ;;  %v1042_v33 = vor.u32 1.1754944e-38, %v1041_v61 }
 0x201   :  { %v828_v5 = vmul.f32 %v827_v3, %v2085_v42  ;;  %vm915_vm15 = vweird.f32 %v2384_v19  ;;  %v961_v59 = vand.u32 2147483648, %v2397_v15  ;;  %v865_v27 = vadd.f32 0.112945676, %v864_v47 }
 0x202   :  { %v1436_v14 = vclamps-f32 %v1004_v60, 1.0  ;;  %v1511_v39 = vpop.eup %1510  ;;  %v1033_v31 = vmul.f32 %v1509_v28, %v1032_v52  ;;  %vm1036_vm0 = vweird.f32 %v1509_v28  ;;  %v959_v37 = vand.u32 2147483647, %v2397_v15 }
 0x203   :  { %v2416_v50 = vadd.f32 1.0, %v828_v5  ;;  %v911_v56 = vmul.f32 %v1511_v39, %v2384_v19  ;;  %vm2419_vm1 = vcmp.eq.f32.partialorder %v919_v20, 8.507059e+37  ;;  %v922_v42 = vor.u32 1.1754944e-38, %v921_v34  ;;  %vm1037_vm3 = vmor %vm1035_vm13, %vm1036_vm0 }
 0x204   :  { %v866_v38 = vmul.f32 %v865_v27, %v2131_v48  ;;  %v1034_v58 = vadd.f32 %v1509_v28, %v1033_v31  ;;  %vm955_vm2 = vweird.f32 %v2397_v15  ;;  %v741_v57 = vadd.f32 0.001143296, %v740_v43 }
 0x205   :  { %1514 = vrcp.f32 %v2416_v50  ;;  %v1513_v25 = vpop.eup %1512  ;;  %v1295_v40 = vadd.f32 1.0, %v1436_v14  ;;  %v912_v11 = vsub.f32 1.0, %v911_v56  ;;  %v962_v54 = vor.u32 1.1754944e-38, %v961_v59 }
 0x206   :  { %v867_v22 = vadd.f32 0.4994258, %v866_v38  ;;  %v1038_v51 = vsel %vm1037_vm3, %v1509_v28, %v1034_v58  ;;  %vm916_vm4 = vweird.f32 %v1511_v39  ;;  %v951_v0 = vmul.f32 %v1513_v25, %v2397_v15 }
 0x207   :  { %vm2429_vm5 = vcmp.eq.f32.partialorder %v959_v37, 8.507059e+37  ;;  %v839_v7 = vand.u32 2147483647, %v2416_v50  ;;  %v1043_v16 = vsel %vm2408_vm14, %v1042_v33, %v1038_v51  ;;  %v913_v12 = vmul.f32 %v1511_v39, %v912_v11  ;;  %vm917_vm8 = vmor %vm915_vm15, %vm916_vm4 }
 0x208   :  { %v841_v23 = vand.u32 2147483648, %v2416_v50  ;;  %v868_v1 = vmul.f32 %v867_v22, %v2131_v48  ;;  %v1044_v45 = vmul.f32 %v1043_v16, %v2212_v6  ;;  %v952_v18 = vsub.f32 1.0, %v951_v0 }
 0x209   :  { %v742_v63 = vmul.f32 %v741_v57, %v1983_v4  ;;  %v781_v36 = vadd.f32 0.001143296, %v780_v29  ;;  %v1311_v10 = vmul.f32 %v1295_v40, %v2045_v24  ;;  %v914_v43 = vadd.f32 %v1511_v39, %v913_v12  ;;  %v2605_v24 = vld [vmem:[#allocation15_spill] sm:$0xff] }
 0x20a   :  { %vm956_vm6 = vweird.f32 %v1513_v25  ;;  %vm835_vm7 = vweird.f32 %v2416_v50  ;;  %v2442_v8 = vadd.f32 1.0, %v868_v1  ;;  %v1437_v47 = vclamps-f32 %v1044_v45, 1.0 }
 0x20b   :  { %v1515_v61 = vpop.eup %1514  ;;  %v953_v48 = vmul.f32 %v1513_v25, %v952_v18  ;;  %v743_v6 = vadd.f32 0.014752088, %v742_v63  ;;  %v782_v28 = vmul.f32 %v781_v36, %v2047_v32  ;;  %v918_v49 = vsel %vm917_vm8, %v1511_v39, %v914_v43  ;;  %vm957_vm10 = vmor %vm955_vm2, %vm956_vm6  ;;  %v2604_v63 = vld [vmem:[#allocation17_spill] sm:$0xff] }
 0x20c   :  { %v831_v9 = vmul.f32 %v1515_v61, %v2416_v50  ;;  %vm2449_vm9 = vcmp.eq.f32.partialorder %v839_v7, 8.507059e+37  ;;  %1516 = vrcp.f32 %v2442_v8  ;;  %v1296_v3 = vadd.f32 1.0, %v1437_v47 }
 0x20d   :  { %v923_v13 = vsel %vm2419_vm1, %v922_v42, %v918_v49  ;;  %v954_v53 = vadd.f32 %v1513_v25, %v953_v48  ;;  %v842_v19 = vor.u32 1.1754944e-38, %v841_v23  ;;  %v660_v20 = vmul.f32 3.8918573e-05, %v1952_v55  ;;  %v2603_v23 = vld [vmem:[#allocation20_spill] sm:$0xff] }
 0x20e   :  { %v924_v29 = vmul.f32 %v923_v13, %v2103_v30  ;;  %v832_v60 = vsub.f32 1.0, %v831_v9  ;;  %v700_v34 = vmul.f32 3.8918573e-05, %v1968_v46  ;;  %v1312_v52 = vmul.f32 %v1296_v3, %v2134_v21 }
 0x20f   :  { %v958_v62 = vsel %vm957_vm10, %v1513_v25, %v954_v53  ;;  %v744_v33 = vmul.f32 %v743_v6, %v1983_v4  ;;  %v783_v5 = vadd.f32 0.014752088, %v782_v28  ;;  %vm836_vm11 = vweird.f32 %v1515_v61 }
 0x210   :  { %v1434_v14 = vclamps-f32 %v924_v29, 1.0  ;;  %v963_v59 = vsel %vm2429_vm5, %v962_v54, %v958_v62  ;;  %v833_v30 = vmul.f32 %v1515_v61, %v832_v60  ;;  %v1324_v27 = vpack.c.bf16 %v1312_v52, %v1311_v10  ;;  %vm837_vm12 = vmor %vm835_vm7, %vm836_vm11  ;;  %v2606_v60 = vld [vmem:[#allocation13_spill] sm:$0xff]  ;;  %v2608_v62 = vld [vmem:[#allocation19_spill] sm:$0xff] }
 0x211   :  { %v964_v15 = vmul.f32 %v963_v59, %v2145_v17  ;;  %v879_v39 = vand.u32 2147483647, %v2442_v8  ;;  %v745_v31 = vadd.f32 0.112945676, %v744_v33  ;;  %v784_v21 = vmul.f32 %v783_v5, %v2047_v32 }
 0x212   :  { %v1517_v37 = vpop.eup %1516  ;;  %v1293_v56 = vadd.f32 1.0, %v1434_v14  ;;  %v834_v35 = vadd.f32 %v1515_v61, %v833_v30  ;;  %v661_v42 = vadd.f32 0.001143296, %v660_v20  ;;  %1337 = vmatpush.bf16.msra.mxu1 %v1324_v27  ;;  %v881_v57 = vand.u32 2147483648, %v2442_v8 }
 0x213   :  { %v1435_v38 = vclamps-f32 %v964_v15, 1.0  ;;  %v871_v58 = vmul.f32 %v1517_v37, %v2442_v8  ;;  %v746_v17 = vmul.f32 %v745_v31, %v1983_v4  ;;  %vm876_vm13 = vweird.f32 %v1517_v37  ;;  %v2609_v15 = vld [vmem:[#allocation14_spill] sm:$0xff] }
 0x214   :  { %v838_v25 = vsel %vm837_vm12, %v1515_v61, %v834_v35  ;;  %v785_v40 = vadd.f32 0.112945676, %v784_v21  ;;  %v662_v11 = vmul.f32 %v661_v42, %v1952_v55  ;;  %v1309_v50 = vmul.f32 %v1293_v56, %v1999_v26 }
 0x215   :  { %v1294_v54 = vadd.f32 1.0, %v1435_v38  ;;  %v843_v22 = vsel %vm2449_vm9, %v842_v19, %v838_v25  ;;  %v872_v51 = vsub.f32 1.0, %v871_v58  ;;  %v747_v0 = vadd.f32 0.4994258, %v746_v17 }
 0x216   :  { %v786_v44 = vmul.f32 %v785_v40, %v2047_v32  ;;  %v663_v7 = vadd.f32 0.014752088, %v662_v11  ;;  %v701_v16 = vadd.f32 0.001143296, %v700_v34  ;;  %v844_v1 = vmul.f32 %v843_v22, %v2603_v23  ;;  %v2607_v34 = vld [vmem:[#allocation18_spill] sm:$0xff] }
 0x217   :  { %v1310_v12 = vmul.f32 %v1294_v54, %v2021_v41  ;;  %v873_v45 = vmul.f32 %v1517_v37, %v872_v51  ;;  %v748_v18 = vmul.f32 %v747_v0, %v1983_v4  ;;  %v859_v36 = vmul.f32 %v2347_v2, %v2604_v63 }
 0x218   :  { %v787_v10 = vadd.f32 0.4994258, %v786_v44  ;;  %v664_v43 = vmul.f32 %v663_v7, %v1952_v55  ;;  %v702_v61 = vmul.f32 %v701_v16, %v1968_v46  ;;  %vm875_vm14 = vweird.f32 %v2442_v8 }
 0x219   :  { %v1323_v26 = vpack.c.bf16 %v1310_v12, %v1309_v50  ;;  %v874_v47 = vadd.f32 %v1517_v37, %v873_v45  ;;  %v2487_v48 = vadd.f32 1.0, %v748_v18  ;;  %vm877_vm15 = vmor %vm875_vm14, %vm876_vm13  ;;  %v882_v41 = vor.u32 1.1754944e-38, %v881_v57 }
 0x21a   :  { %v788_v6 = vmul.f32 %v787_v10, %v2047_v32  ;;  %v665_v28 = vadd.f32 0.112945676, %v664_v43  ;;  %v703_v49 = vadd.f32 0.014752088, %v702_v61  ;;  %v1432_v2 = vclamps-f32 %v844_v1, 1.0 }
 0x21b   :  { %1338 = vmatpush.bf16.msra.mxu1 %v1323_v26  ;;  %v878_v9 = vsel %vm877_vm15, %v1517_v37, %v874_v47  ;;  %vm880_vm0 = vcmp.eq.f32.partialorder %v879_v39, 8.507059e+37  ;;  %1518 = vrcp.f32 %v2487_v48  ;;  %v654_v3 = vadd.f32 0.05243302, %v2605_v24  ;;  %v2610_v37 = vld [vmem:[#allocation16_spill] sm:$0xff]  ;;  %v2611_v47 = vld [vmem:[#allocation10_spill] sm:$0xff] }
 0x21c   :  { %v883_v13 = vsel %vm880_vm0, %v882_v41, %v878_v9  ;;  %v2493_v53 = vadd.f32 1.0, %v788_v6  ;;  %v666_v19 = vmul.f32 %v665_v28, %v1952_v55  ;;  %v704_v29 = vmul.f32 %v703_v49, %v1968_v46 }
 0x21d   :  { %v884_v8 = vmul.f32 %v883_v13, %v859_v36  ;;  %v693_v20 = vmul.f32 %v2606_v60, %v1968_v46  ;;  %v736_v52 = vadd.f32 0.18741608, %v2607_v34  ;;  %v776_v33 = vadd.f32 0.18741608, %v2608_v62  ;;  %v2612_v13 = vld [vmem:[#allocation12_spill] sm:$0xff] }
 0x21e   :  { %1520 = vrcp.f32 %v2493_v53  ;;  %v1291_v14 = vadd.f32 1.0, %v1432_v2  ;;  %v667_v59 = vadd.f32 0.4994258, %v666_v19  ;;  %v705_v30 = vadd.f32 0.112945676, %v704_v29 }
 0x21f   :  { %v1433_v5 = vclamps-f32 %v884_v8, 1.0  ;;  %v655_v27 = vmul.f32 %v654_v3, %v1952_v55  ;;  %v619_v39 = vmul.f32 0.5, %v2609_v15  ;;  %v620_v56 = vmul.f32 0.5, %v2610_v37 }
 0x220   :  { %v668_v21 = vmul.f32 %v667_v59, %v1952_v55  ;;  %v706_v42 = vmul.f32 %v705_v30, %v1968_v46  ;;  %v694_v38 = vadd.f32 0.05243302, %v693_v20  ;;  %v737_v58 = vmul.f32 %v736_v52, %v1983_v4  ;;  %v2613_v30 = vld [vmem:[#allocation9_spill] sm:$0xff] }
 0x221   :  { %v1519_v31 = vpop.eup %1518  ;;  %v1292_v35 = vadd.f32 1.0, %v1433_v5  ;;  %v777_v57 = vmul.f32 %v776_v33, %v2047_v32  ;;  %v1307_v25 = vmul.f32 %v1291_v14, %v619_v39  ;;  %v761_v0 = vand.u32 2147483648, %v2487_v48 }
 0x222   :  { %v751_v17 = vmul.f32 %v1519_v31, %v2487_v48  ;;  %v2510_v11 = vadd.f32 1.0, %v668_v21  ;;  %v707_v54 = vadd.f32 0.4994258, %v706_v42  ;;  %v656_v50 = vadd.f32 0.18741608, %v655_v27 }
 0x223   :  { %v1308_v40 = vmul.f32 %v1292_v35, %v620_v56  ;;  %v738_v4 = vadd.f32 1.1283791, %v737_v58  ;;  %vm756_vm1 = vweird.f32 %v1519_v31  ;;  %v759_v32 = vand.u32 2147483647, %v2487_v48  ;;  %v2615_v56 = vld [vmem:[#allocation11_spill] sm:$0xff] }
 0x224   :  { %v1521_v22 = vpop.eup %1520  ;;  %v752_v51 = vsub.f32 1.0, %v751_v17  ;;  %1522 = vrcp.f32 %v2510_v11  ;;  %v695_v12 = vmul.f32 %v694_v38, %v1968_v46  ;;  %v778_v23 = vadd.f32 1.1283791, %v777_v57 }
 0x225   :  { %v1322_v44 = vpack.c.bf16 %v1308_v40, %v1307_v25  ;;  %v791_v7 = vmul.f32 %v1521_v22, %v2493_v53  ;;  %v708_v45 = vmul.f32 %v707_v54, %v1968_v46  ;;  %vm755_vm2 = vweird.f32 %v2487_v48 }
 0x226   :  { %v753_v16 = vmul.f32 %v1519_v31, %v752_v51  ;;  %v762_v63 = vor.u32 1.1754944e-38, %v761_v0  ;;  %v801_v36 = vand.u32 2147483648, %v2493_v53  ;;  %vm757_vm3 = vmor %vm755_vm2, %vm756_vm1  ;;  %vm796_vm4 = vweird.f32 %v1521_v22 }
 0x227   :  { %1339 = vmatpush.bf16.msra.mxu1 %v1322_v44  ;;  %v792_v1 = vsub.f32 1.0, %v791_v7  ;;  %v799_v43 = vand.u32 2147483647, %v2493_v53  ;;  %v709_v61 = vadd.f32 1.0, %v708_v45  ;;  %v657_v26 = vmul.f32 %v656_v50, %v1952_v55  ;;  %v2616_v44 = vld [vmem:[#allocation8_spill] sm:$0xff]  ;;  %v2617_v45 = vld [vmem:[#allocation5_spill] sm:$0xff] }
 0x228   :  { %v754_v18 = vadd.f32 %v1519_v31, %v753_v16  ;;  %v739_v41 = vmul.f32 %v738_v4, %v2611_v47  ;;  %vm760_vm5 = vcmp.eq.f32.partialorder %v759_v32, 8.507059e+37  ;;  %vm795_vm6 = vweird.f32 %v2493_v53  ;;  %v1319_v47 = vld [vmem:[%s2547_s5] sm:$0x3]  ;;  %s1562_s5 = smov [#allocation2]  }
 0x229   :  { %v793_v10 = vmul.f32 %v1521_v22, %v792_v1  ;;  %1524 = vrcp.f32 %v709_v61  ;;  %v696_v48 = vadd.f32 0.18741608, %v695_v12  ;;  %vm797_vm7 = vmor %vm795_vm6, %vm796_vm4  ;;  %v802_v24 = vor.u32 1.1754944e-38, %v801_v36  ;;  %s1373_s16 = sshll.u32 %s1562_s5, 4  ;;  %s1374_s16 = int_to_ptr.vmem [resolvable:$true] %s1373_s16 }
 0x22a   :  { %v758_v6 = vsel %vm757_vm3, %v1519_v31, %v754_v18  ;;  %v1523_v28 = vpop.eup %1522  ;;  %v779_v8 = vmul.f32 %v778_v23, %v2612_v13  ;;  %vm800_vm8 = vcmp.eq.f32.partialorder %v799_v43, 8.507059e+37  ;;  %v658_v20 = vadd.f32 1.1283791, %v657_v26  ;;  %v2614_v31 = vld [vmem:[#allocation6_spill] sm:$0xff] }
 0x22b   :  { %v763_v49 = vsel %vm760_vm5, %v762_v63, %v758_v6  ;;  %v794_v2 = vadd.f32 %v1521_v22, %v793_v10  ;;  %v671_v3 = vmul.f32 %v1523_v28, %v2510_v11  ;;  %v681_v52 = vand.u32 2147483648, %v2510_v11  ;;  %v2618_v63 = vld [vmem:[#allocation7_spill] sm:$0xff] }
 0x22c   :  { %v764_v9 = vmul.f32 %v763_v49, %v739_v41  ;;  %v697_v53 = vmul.f32 %v696_v48, %v1968_v46  ;;  %vm676_vm9 = vweird.f32 %v1523_v28  ;;  %v679_v33 = vand.u32 2147483647, %v2510_v11  ;;  %v1332_v41 = vpop.permute.xlu1 %1331 }
 0x22d   :  { %v798_v19 = vsel %vm797_vm7, %v1521_v22, %v794_v2  ;;  %v672_v60 = vsub.f32 1.0, %v671_v3  ;;  %v617_v27 = vmul.f32 0.5, %v2613_v30  ;;  %vm675_vm10 = vweird.f32 %v2510_v11 }
 0x22e   :  { %v1430_v55 = vclamps-f32 %v764_v9, 1.0  ;;  %v803_v29 = vsel %vm800_vm8, %v802_v24, %v798_v19  ;;  %v659_v37 = vmul.f32 %v658_v20, %v2614_v31  ;;  %v618_v35 = vmul.f32 0.5, %v2615_v56  ;;  %vm677_vm11 = vmor %vm675_vm10, %vm676_vm9 }
 0x22f   :  { %v804_v34 = vmul.f32 %v803_v29, %v779_v8  ;;  %v673_v62 = vmul.f32 %v1523_v28, %v672_v60  ;;  %v1525_v5 = vpop.eup %1524  ;;  %v682_v46 = vor.u32 1.1754944e-38, %v681_v52  ;;  %v698_v42 = vadd.f32 1.1283791, %v697_v53 }
 0x230   :  { %v1289_v59 = vadd.f32 1.0, %v1430_v55  ;;  %v711_v39 = vmul.f32 %v1525_v5, %v709_v61  ;;  %vm680_vm12 = vcmp.eq.f32.partialorder %v679_v33, 8.507059e+37  ;;  %v721_v40 = vand.u32 2147483648, %v709_v61 }
 0x231   :  { %v1431_v14 = vclamps-f32 %v804_v34, 1.0  ;;  %v674_v15 = vadd.f32 %v1523_v28, %v673_v62  ;;  %vm716_vm13 = vweird.f32 %v1525_v5  ;;  %v719_v11 = vand.u32 2147483647, %v709_v61 }
 0x232   :  { %v712_v58 = vsub.f32 1.0, %v711_v39  ;;  %v1305_v57 = vmul.f32 %v1289_v59, %v617_v27  ;;  %vm715_vm14 = vweird.f32 %v709_v61  ;;  %v722_v50 = vor.u32 1.1754944e-38, %v721_v40 }
 0x233   :  { %v1290_v21 = vadd.f32 1.0, %v1431_v14  ;;  %v678_v38 = vsel %vm677_vm11, %v1523_v28, %v674_v15  ;;  %vm717_vm15 = vmor %vm715_vm14, %vm716_vm13  ;;  %v699_v7 = vmul.f32 %v698_v42, %v2616_v44  ;;  %vm720_vm0 = vcmp.eq.f32.partialorder %v719_v11, 8.507059e+37 }
 0x234   :  { %v683_v25 = vsel %vm680_vm12, %v682_v46, %v678_v38  ;;  %v713_v22 = vmul.f32 %v1525_v5, %v712_v58  ;;  %v615_v18 = vmul.f32 0.5, %v2617_v45  ;;  %v616_v36 = vmul.f32 0.5, %v2618_v63 }
 0x235   :  { %v1306_v17 = vmul.f32 %v1290_v21, %v618_v35  ;;  %v684_v54 = vmul.f32 %v683_v25, %v659_v37  ;;  %vm1347_vm1 = vcmask 1042432  }
 0x236   :  { %v714_v0 = vadd.f32 %v1525_v5, %v713_v22 }
 0x237   :  { %v1321_v51 = vpack.c.bf16 %v1306_v17, %v1305_v57  ;;  %v1428_v4 = vclamps-f32 %v684_v54, 1.0 }
 0x238   :  { %v718_v16 = vsel %vm717_vm15, %v1525_v5, %v714_v0 }
 0x239   :  { %1340 = vmatpush.bf16.msra.mxu1 %v1321_v51  ;;  %v723_v32 = vsel %vm720_vm0, %v722_v50, %v718_v16  ;;  %v1287_v1 = vadd.f32 1.0, %v1428_v4 }
 0x23a   :  { %v724_v12 = vmul.f32 %v723_v32, %v699_v7 }
 0x23b   :  { %v1303_v43 = vmul.f32 %v1287_v1, %v615_v18 }
 0x23c   :  { %v1429_v23 = vclamps-f32 %v724_v12, 1.0 }
 0x23e   :  { %v1288_v10 = vadd.f32 1.0, %v1429_v23 }
 0x240   :  { %v1304_v26 = vmul.f32 %v1288_v10, %v616_v36 }
 0x242   :  { %v1320_v61 = vpack.c.bf16 %v1304_v26, %v1303_v43 }
 0x244   :  { %1341 = vmatpush.bf16.msra.mxu1 %v1320_v61 }
 0x247   :  { %1342 = vmatmul.bf16.vlgmr.msra.gmra.mxu1 %v1319_v47 }
 0x2c4   :  { %v1343_v6 = vpop.f32.mrf.mxu1 }
 0x2c5   :  { %v1344_v28 = vadd.f32 %v1343_v6, %v1332_v41 }
 0x2c7   :  { %v1348_v49 = vsel %vm1347_vm1, %v1344_v28, -inf }
 0x2c8   :  { %v1349_v2 = vrot.slane %v1348_v49, 4 }
 0x2ca   :  { %v1350_v48 = vmax.f32 %v1348_v49, %v1349_v2 }
 0x2cc   :  { %v1351_v9 = vrot.slane %v1350_v48, 2  ;;  %v1345_v24 = vpop.f32.mrf.mxu1 }
 0x2ce   :  { %v1352_v3 = vmax.f32 %v1350_v48, %v1351_v9 }
 0x2d0   :  { %v1353_v13 = vrot.slane %v1352_v3, 1 }
 0x2d2   :  { %v1354_v8 = vmax.f32 %v1352_v3, %v1353_v13 }
 0x2d4   :  { %v1355_v19 = vsub.f32 %v1344_v28, %v1354_v8 }
 0x2d6   :  { %v1356_v55 = vmul.f32 1.442695, %v1355_v19 }
 0x2d8   :  { %1526 = vpow2.f32 %v1356_v55 }
 0x2de   :  { %v1527_v29 = vpop.eup %1526 }
 0x2df   :  { %v1358_v60 = vsel %vm1347_vm1, %v1527_v29, 0.0 }
 0x2e0   :  { %v1359_v20 = vrot.slane %v1358_v60, 4 }
 0x2e2   :  { %v1360_v34 = vadd.f32 %v1359_v20, %v1358_v60 }
 0x2e4   :  { %v1361_v52 = vrot.slane %v1360_v34, 2 }
 0x2e6   :  { %v1362_v53 = vadd.f32 %v1361_v52, %v1360_v34 }
 0x2e8   :  { %v1363_v62 = vrot.slane %v1362_v53, 1 }
 0x2ea   :  { %v1364_v33 = vadd.f32 %v1363_v62, %v1362_v53 }
 0x2ec   :  { %1528 = vrcp.f32 %v1364_v33 }
 0x2f2   :  { %v1529_v5 = vpop.eup %1528 }
 0x2f3   :  { %v1366_v14 = vmul.f32 %v1529_v5, %v1527_v29 }
 0x2f5   :  { %1367 = vst [vmem:[#allocation2] sm:$0x7] %v1366_v14 }
 0x2f6   :  { %1378 = dma.vmem_to_hbm [thread:$0]  %s1374_s16, 64, %s1376_s0, [#allocation3]  }
 0x2f7   :  { %1554 = dma.done.wait [#allocation3], 64  }
 0x2f8   :  { %1555 = vsyncadd [#allocation3], 4294967232 }
 0x2f9   :  { %1383 = vsyncpa [#allocation3], 1 }

</bundles_post_ra>
